<compile_context>
chip_gen: v6e
topology: v6e:2x2x1
jax: 0.10.0
libtpu: 0.0.40
codegen_flags: <defaults>
</compile_context>

<pallas_src>
import functools

import jax
import jax.numpy as jnp
from jax.experimental import pallas as pl
from jax.experimental.pallas import tpu as pltpu


def _round_up(x, m):
    return (x + m - 1) // m * m


def _ln(h, g, b, eps=1e-5):
    mu = jnp.mean(h, axis=-1, keepdims=True)
    var = jnp.mean(jnp.square(h - mu), axis=-1, keepdims=True)
    return (h - mu) * jax.lax.rsqrt(var + eps) * g + b


# --------------------------------------------------------------------------
# Fused kernel: all transformer blocks + final LN + lm_head, grid = (B,)
# --------------------------------------------------------------------------
def gpt_kernel(x_ref, wq_ref, wk_ref, wv_ref, wo_ref, w1_ref, w2_ref,
               pvec_ref, b1_ref, lnf_ref, wlm_ref, blm_ref, out_ref,
               *, n_layers, n_heads, head_size):
    T, E = x_ref.shape[1], x_ref.shape[2]
    H, D = n_heads, head_size
    bf = jnp.bfloat16

    x = x_ref[0].astype(jnp.float32)                 # (T, E) activation carry

    # Causal mask, finite fill (NaN-safe).
    row = jax.lax.broadcasted_iota(jnp.int32, (T, T), 0)
    col = jax.lax.broadcasted_iota(jnp.int32, (T, T), 1)
    causal = (col <= row)[None, :, :]                # (1, T, T), broadcasts over H
    neg = jnp.float32(-1e30)
    scale = jnp.float32(head_size) ** -0.5

    def bmm(a, b):        # (H,M,K) x (H,K,N) -> (H,M,N), f32 accumulation
        return jax.lax.dot_general(a, b, (((2,), (1,)), ((0,), (0,))),
                                   preferred_element_type=jnp.float32)

    def bmm_nt(a, b):     # (H,M,K) x (H,N,K) -> (H,M,N)  (rhs "transposed")
        return jax.lax.dot_general(a, b, (((2,), (2,)), ((0,), (0,))),
                                   preferred_element_type=jnp.float32)

    for l in range(n_layers):                        # static unroll (L small)
        pvec = pvec_ref[l]                           # (8, E) packed f32 params
        ln1g, ln1b = pvec[0:1, :], pvec[1:2, :]
        ln2g, ln2b = pvec[2:3, :], pvec[3:4, :]
        bo, b2 = pvec[4:5, :], pvec[5:6, :]
        b1 = b1_ref[l]                               # (1, 4E)

        # ---- multi-head causal self-attention (pre-LN), batched over H ----
        h = _ln(x, ln1g, ln1b)
        hb = jnp.broadcast_to(h.astype(bf)[None], (H, T, E))   # (H, T, E)

        q3 = bmm(hb, wq_ref[l]) * scale              # (H, T, D) f32, scale folded
        k3 = bmm(hb, wk_ref[l])                      # (H, T, D)
        v3 = bmm(hb, wv_ref[l])                      # (H, T, D)

        s = bmm_nt(q3.astype(bf), k3.astype(bf))     # (H, T, T) scores
        s = jnp.where(causal, s, neg)
        s = s - jnp.max(s, axis=-1, keepdims=True)
        e = jnp.exp(s)
        p = e * pl.reciprocal(jnp.sum(e, axis=-1, keepdims=True), approx=True)

        o3 = bmm(p.astype(bf), v3.astype(bf))        # (H, T, D)
        # concat_h(o_h) @ Wo  ==  sum_h  o_h @ Wo[h*D:(h+1)*D, :]
        proj = jnp.sum(bmm(o3.astype(bf), wo_ref[l]), axis=0)  # (T, E)
        x = x + proj + bo

        # ---- feed-forward (pre-LN) ----------------------------------------
        h2 = _ln(x, ln2g, ln2b).astype(bf)
        f = jnp.dot(h2, w1_ref[l], preferred_element_type=jnp.float32) + b1
        f = jnp.maximum(f, 0.0).astype(bf)
        x = x + jnp.dot(f, w2_ref[l], preferred_element_type=jnp.float32) + b2

    # ---- final LayerNorm + lm_head (once per row block, lane-dense out) ----
    hf = _ln(x, lnf_ref[0:1, :], lnf_ref[1:2, :]).astype(bf)
    logits = jnp.dot(hf, wlm_ref[...],
                     preferred_element_type=jnp.float32) + blm_ref[...]
    out_ref[0] = logits.astype(out_ref.dtype)


def gpt_fused(x_emb, wq_h, wk_h, wv_h, wo_h, w1, w2, pvec, b1, lnf, wlm, blm,
              *, n_heads, head_size):
    B, T, E = x_emb.shape
    L = w1.shape[0]
    H4 = w1.shape[-1]
    Vp = wlm.shape[-1]
    kernel = functools.partial(gpt_kernel, n_layers=L, n_heads=n_heads,
                               head_size=head_size)
    const3 = lambda b: (0, 0, 0)
    const4 = lambda b: (0, 0, 0, 0)
    return pl.pallas_call(
        kernel,
        out_shape=jax.ShapeDtypeStruct((B, T, Vp), jnp.float32),
        grid=(B,),
        in_specs=[
            pl.BlockSpec((1, T, E), lambda b: (b, 0, 0)),     # x for batch b
            pl.BlockSpec(wq_h.shape, const4),                 # (L, H, E, D) resident
            pl.BlockSpec(wk_h.shape, const4),
            pl.BlockSpec(wv_h.shape, const4),
            pl.BlockSpec(wo_h.shape, const4),                 # (L, H, D, E)
            pl.BlockSpec(w1.shape, const3),                   # (L, E, 4E)
            pl.BlockSpec(w2.shape, const3),                   # (L, 4E, E)
            pl.BlockSpec(pvec.shape, const3),                 # (L, 8, E)
            pl.BlockSpec(b1.shape, const3),                   # (L, 1, 4E)
            pl.BlockSpec(lnf.shape, lambda b: (0, 0)),        # (2, E)
            pl.BlockSpec(wlm.shape, lambda b: (0, 0)),        # (E, Vp)
            pl.BlockSpec(blm.shape, lambda b: (0, 0)),        # (1, Vp)
        ],
        out_specs=pl.BlockSpec((1, T, Vp), lambda b: (b, 0, 0)),
        compiler_params=pltpu.CompilerParams(
            dimension_semantics=("parallel",)),               # 2-wide for v7x TCs
    )(x_emb, wq_h, wk_h, wv_h, wo_h, w1, w2, pvec, b1, lnf, wlm, blm)


# --------------------------------------------------------------------------
# Full forward (embedding gather + weight layout prep are plain-JAX glue)
# --------------------------------------------------------------------------
def gpt_forward(idx, params, *, n_heads, head_size):
    B, T = idx.shape
    E = params["tok"].shape[-1]
    V = params["wlm"].shape[-1]
    Vp = _round_up(V, 128)
    L = params["wq"].shape[0]
    H, D = n_heads, head_size
    bf = jnp.bfloat16

    # Token + position embedding gather (XLA glue).
    x_emb = (params["tok"][idx] + params["pos"][:T][None]).astype(jnp.float32)

    # Head-split weight layouts (one-time host/XLA layout transform):
    #   q/k/v:  (L, E, E) -> (L, H, E, D)   (columns of head h)
    #   wo:     (L, E, E) -> (L, H, D, E)   (rows of head h)
    def split_cols(w):
        return w.reshape(L, E, H, D).transpose(0, 2, 1, 3).astype(bf)
    wq_h = split_cols(params["wq"])
    wk_h = split_cols(params["wk"])
    wv_h = split_cols(params["wv"])
    wo_h = params["wo"].reshape(L, H, D, E).astype(bf)

    # Pack the small per-layer vectors into one (L, 8, E) array.
    zeros = jnp.zeros_like(params["bo"])
    pvec = jnp.stack([params["ln1g"], params["ln1b"],
                      params["ln2g"], params["ln2b"],
                      params["bo"], params["b2"], zeros, zeros], axis=1)
    b1 = params["b1"][:, None, :]                        # (L, 1, 4E)
    lnf = jnp.stack([params["lnfg"], params["lnfb"]], axis=0)  # (2, E)

    # Lane-align vocab; padded columns sliced off afterwards.
    wlm = jnp.zeros((E, Vp), bf).at[:, :V].set(params["wlm"].astype(bf))
    blm = jnp.zeros((1, Vp), jnp.float32).at[0, :V].set(params["blm"])

    logits = gpt_fused(x_emb,
                       wq_h, wk_h, wv_h, wo_h,
                       params["w1"].astype(bf), params["w2"].astype(bf),
                       pvec, b1, lnf, wlm, blm,
                       n_heads=n_heads, head_size=head_size)
    return logits[:, :, :V]


# --------------------------------------------------------------------------
# Parameter init + pure-JAX reference (mirrors the kernel's bf16 matmuls)
# --------------------------------------------------------------------------
def init_params(key, vocab, n_emb, block_size, n_layers):
    std = 0.02
    ks = jax.random.split(key, 9)
    E, H4 = n_emb, 4 * n_emb
    p = {
        "tok":  std * jax.random.normal(ks[0], (vocab, E)),
        "pos":  std * jax.random.normal(ks[1], (block_size, E)),
        "wq":   std * jax.random.normal(ks[2], (n_layers, E, E)),
        "wk":   std * jax.random.normal(ks[3], (n_layers, E, E)),
        "wv":   std * jax.random.normal(ks[4], (n_layers, E, E)),
        "wo":   std * jax.random.normal(ks[5], (n_layers, E, E)),
        "bo":   jnp.zeros((n_layers, E)),
        "ln1g": jnp.ones((n_layers, E)),
        "ln1b": jnp.zeros((n_layers, E)),
        "ln2g": jnp.ones((n_layers, E)),
        "ln2b": jnp.zeros((n_layers, E)),
        "w1":   std * jax.random.normal(ks[6], (n_layers, E, H4)),
        "b1":   jnp.zeros((n_layers, H4)),
        "w2":   std * jax.random.normal(ks[7], (n_layers, H4, E)),
        "b2":   jnp.zeros((n_layers, E)),
        "lnfg": jnp.ones((E,)),
        "lnfb": jnp.zeros((E,)),
        "wlm":  std * jax.random.normal(ks[8], (E, vocab)),
        "blm":  jnp.zeros((vocab,)),
    }
    return {k: v.astype(jnp.float32) for k, v in p.items()}


def reference_forward(idx, params, *, n_heads, head_size):
    """Pure-JAX GPTLanguageModel.forward (targets=None), bf16-matmul matched."""
    bf = jnp.bfloat16

    def mm(a, w):
        return jnp.dot(a.astype(bf), w.astype(bf),
                       preferred_element_type=jnp.float32)

    def ln(h, g, b):
        mu = h.mean(-1, keepdims=True)
        var = ((h - mu) ** 2).mean(-1, keepdims=True)
        return (h - mu) * jax.lax.rsqrt(var + 1e-5) * g + b

    T = idx.shape[1]
    x = (params["tok"][idx] + params["pos"][:T][None]).astype(jnp.float32)
    B, _, E = x.shape
    H, D = n_heads, head_size
    mask = jnp.tril(jnp.ones((T, T), bool))
    L = params["wq"].shape[0]
    for l in range(L):
        h = ln(x, params["ln1g"][l], params["ln1b"][l])
        q = mm(h, params["wq"][l]) * D ** -0.5
        k = mm(h, params["wk"][l])
        v = mm(h, params["wv"][l])
        qh = q.reshape(B, T, H, D).astype(bf)
        kh = k.reshape(B, T, H, D).astype(bf)
        vh = v.reshape(B, T, H, D).astype(bf)
        s = jnp.einsum("bqhd,bkhd->bhqk", qh, kh,
                       preferred_element_type=jnp.float32)
        s = jnp.where(mask, s, -1e30)
        p = jax.nn.softmax(s, axis=-1)
        o = jnp.einsum("bhqk,bkhd->bqhd", p.astype(bf), vh,
                       preferred_element_type=jnp.float32).reshape(B, T, E)
        x = x + mm(o, params["wo"][l]) + params["bo"][l]
        h2 = ln(x, params["ln2g"][l], params["ln2b"][l])
        f = jnp.maximum(mm(h2, params["w1"][l]) + params["b1"][l], 0.0)
        x = x + mm(f, params["w2"][l]) + params["b2"][l]
    h = ln(x, params["lnfg"], params["lnfb"])
    return mm(h, params["wlm"]) + params["blm"]


if __name__ == "__main__":
    VOCAB = 65
    N_EMB = 32
    BLOCK_SIZE = 8
    N_LAYERS = 2
    N_HEADS = 4
    HEAD_SIZE = N_EMB // N_HEADS
    B, T = 2, BLOCK_SIZE

    key = jax.random.PRNGKey(0)
    k_params, k_idx = jax.random.split(key)
    params = init_params(k_params, VOCAB, N_EMB, BLOCK_SIZE, N_LAYERS)
    idx = jax.random.randint(k_idx, (B, T), 0, VOCAB)       # (B, T) token ids

    fwd = jax.jit(functools.partial(gpt_forward,
                                    n_heads=N_HEADS, head_size=HEAD_SIZE))
    logits = jax.block_until_ready(fwd(idx, params))

    ref = reference_forward(idx, params, n_heads=N_HEADS, head_size=HEAD_SIZE)
    assert logits.shape == (B, T, VOCAB)
    max_err = float(jnp.max(jnp.abs(logits - ref)))
    assert jnp.allclose(logits, ref, atol=2e-2, rtol=2e-2), \
        f"mismatch vs JAX reference (max abs err {max_err})"

    print("KERNEL_OK")
</pallas_src>

<mosaic_0001>
module attributes {stable_mosaic.version = 11 : i64} {
  func.func @gpt_kernel(%arg0: i32, %arg1: memref<1x8x32xf32, #tpu.memory_space<vmem>>, %arg2: memref<2x4x32x8xbf16, #tpu.memory_space<vmem>>, %arg3: memref<2x4x32x8xbf16, #tpu.memory_space<vmem>>, %arg4: memref<2x4x32x8xbf16, #tpu.memory_space<vmem>>, %arg5: memref<2x4x8x32xbf16, #tpu.memory_space<vmem>>, %arg6: memref<2x32x128xbf16, #tpu.memory_space<vmem>>, %arg7: memref<2x128x32xbf16, #tpu.memory_space<vmem>>, %arg8: memref<2x8x32xf32, #tpu.memory_space<vmem>>, %arg9: memref<2x1x128xf32, #tpu.memory_space<vmem>>, %arg10: memref<2x32xf32, #tpu.memory_space<vmem>>, %arg11: memref<32x128xbf16, #tpu.memory_space<vmem>>, %arg12: memref<1x128xf32, #tpu.memory_space<vmem>>, %arg13: memref<1x8x128xf32, #tpu.memory_space<vmem>>) attributes {dimension_semantics = [#tpu.dimension_semantics<parallel>], iteration_bounds = array<i64: 2>, scalar_prefetch = 0 : i64, scratch_operands = 0 : i64, tpu.core_type = #tpu.core_type<tc>, window_params = [{transform_indices = @transform_0, window_bounds = array<i64: 1, 8, 32>}, {pipeline_mode = #tpu.pipeline_mode<synchronous>, transform_indices = @transform_1, window_bounds = array<i64: 2, 4, 32, 8>}, {pipeline_mode = #tpu.pipeline_mode<synchronous>, transform_indices = @transform_2, window_bounds = array<i64: 2, 4, 32, 8>}, {pipeline_mode = #tpu.pipeline_mode<synchronous>, transform_indices = @transform_3, window_bounds = array<i64: 2, 4, 32, 8>}, {pipeline_mode = #tpu.pipeline_mode<synchronous>, transform_indices = @transform_4, window_bounds = array<i64: 2, 4, 8, 32>}, {pipeline_mode = #tpu.pipeline_mode<synchronous>, transform_indices = @transform_5, window_bounds = array<i64: 2, 32, 128>}, {pipeline_mode = #tpu.pipeline_mode<synchronous>, transform_indices = @transform_6, window_bounds = array<i64: 2, 128, 32>}, {pipeline_mode = #tpu.pipeline_mode<synchronous>, transform_indices = @transform_7, window_bounds = array<i64: 2, 8, 32>}, {pipeline_mode = #tpu.pipeline_mode<synchronous>, transform_indices = @transform_8, window_bounds = array<i64: 2, 1, 128>}, {pipeline_mode = #tpu.pipeline_mode<synchronous>, transform_indices = @transform_9, window_bounds = array<i64: 2, 32>}, {pipeline_mode = #tpu.pipeline_mode<synchronous>, transform_indices = @transform_10, window_bounds = array<i64: 32, 128>}, {pipeline_mode = #tpu.pipeline_mode<synchronous>, transform_indices = @transform_11, window_bounds = array<i64: 1, 128>}, {transform_indices = @transform_12, window_bounds = array<i64: 1, 8, 128>}]} {
    %c0 = arith.constant 0 : index
    %c0_0 = arith.constant 0 : index
    %c0_1 = arith.constant 0 : index
    %0 = vector.load %arg1[%c0, %c0_0, %c0_1] : memref<1x8x32xf32, #tpu.memory_space<vmem>>, vector<1x8x32xf32>
    %1 = vector.shape_cast %0 : vector<1x8x32xf32> to vector<8x32xf32>
    %2 = tpu.iota {dimensions = array<i32: 0>} : vector<8x8xi32>
    %3 = tpu.iota {dimensions = array<i32: 1>} : vector<8x8xi32>
    %4 = arith.cmpi sle, %3, %2 : vector<8x8xi32>
    %5 = vector.shape_cast %4 : vector<8x8xi1> to vector<1x8x8xi1>
    %cst = arith.constant 8.000000e+00 : f32
    %cst_2 = arith.constant -5.000000e-01 : f32
    %6 = math.powf %cst, %cst_2 : f32
    %c0_3 = arith.constant 0 : index
    %c0_4 = arith.constant 0 : index
    %c0_5 = arith.constant 0 : index
    %7 = vector.load %arg8[%c0_3, %c0_4, %c0_5] : memref<2x8x32xf32, #tpu.memory_space<vmem>>, vector<1x8x32xf32>
    %8 = vector.shape_cast %7 : vector<1x8x32xf32> to vector<8x32xf32>
    %9 = vector.extract_strided_slice %8 {offsets = [0, 0], sizes = [1, 32], strides = [1, 1]} : vector<8x32xf32> to vector<1x32xf32>
    %10 = vector.extract_strided_slice %8 {offsets = [1, 0], sizes = [1, 32], strides = [1, 1]} : vector<8x32xf32> to vector<1x32xf32>
    %11 = vector.extract_strided_slice %8 {offsets = [2, 0], sizes = [1, 32], strides = [1, 1]} : vector<8x32xf32> to vector<1x32xf32>
    %12 = vector.extract_strided_slice %8 {offsets = [3, 0], sizes = [1, 32], strides = [1, 1]} : vector<8x32xf32> to vector<1x32xf32>
    %13 = vector.extract_strided_slice %8 {offsets = [4, 0], sizes = [1, 32], strides = [1, 1]} : vector<8x32xf32> to vector<1x32xf32>
    %14 = vector.extract_strided_slice %8 {offsets = [5, 0], sizes = [1, 32], strides = [1, 1]} : vector<8x32xf32> to vector<1x32xf32>
    %c0_6 = arith.constant 0 : index
    %c0_7 = arith.constant 0 : index
    %c0_8 = arith.constant 0 : index
    %15 = vector.load %arg9[%c0_6, %c0_7, %c0_8] : memref<2x1x128xf32, #tpu.memory_space<vmem>>, vector<1x1x128xf32>
    %16 = vector.shape_cast %15 : vector<1x1x128xf32> to vector<1x128xf32>
    %cst_9 = arith.constant dense<0.000000e+00> : vector<8xf32>
    %17 = vector.multi_reduction <add>, %1, %cst_9 [1] : vector<8x32xf32> to vector<8xf32>
    %18 = vector.shape_cast %17 : vector<8xf32> to vector<8x1xf32>
    %cst_10 = arith.constant 3.200000e+01 : f32
    %19 = vector.broadcast %cst_10 : f32 to vector<8x1xf32>
    %20 = arith.divf %18, %19 : vector<8x1xf32>
    %21 = vector.broadcast %20 : vector<8x1xf32> to vector<8x32xf32>
    %22 = arith.subf %1, %21 : vector<8x32xf32>
    %23 = arith.mulf %22, %22 : vector<8x32xf32>
    %cst_11 = arith.constant dense<0.000000e+00> : vector<8xf32>
    %24 = vector.multi_reduction <add>, %23, %cst_11 [1] : vector<8x32xf32> to vector<8xf32>
    %25 = vector.shape_cast %24 : vector<8xf32> to vector<8x1xf32>
    %cst_12 = arith.constant 3.200000e+01 : f32
    %26 = vector.broadcast %cst_12 : f32 to vector<8x1xf32>
    %27 = arith.divf %25, %26 : vector<8x1xf32>
    %28 = vector.broadcast %20 : vector<8x1xf32> to vector<8x32xf32>
    %29 = arith.subf %1, %28 : vector<8x32xf32>
    %cst_13 = arith.constant 9.99999974E-6 : f32
    %30 = vector.broadcast %cst_13 : f32 to vector<8x1xf32>
    %31 = arith.addf %27, %30 : vector<8x1xf32>
    %32 = math.rsqrt %31 : vector<8x1xf32>
    %33 = vector.broadcast %32 : vector<8x1xf32> to vector<8x32xf32>
    %34 = arith.mulf %29, %33 : vector<8x32xf32>
    %35 = vector.broadcast %9 : vector<1x32xf32> to vector<8x32xf32>
    %36 = arith.mulf %34, %35 : vector<8x32xf32>
    %37 = vector.broadcast %10 : vector<1x32xf32> to vector<8x32xf32>
    %38 = arith.addf %36, %37 : vector<8x32xf32>
    %39 = arith.truncf %38 : vector<8x32xf32> to vector<8x32xbf16>
    %40 = vector.shape_cast %39 : vector<8x32xbf16> to vector<1x8x32xbf16>
    %41 = vector.shape_cast %40 : vector<1x8x32xbf16> to vector<1x8x32xbf16>
    %42 = vector.broadcast %41 : vector<1x8x32xbf16> to vector<4x8x32xbf16>
    %c0_14 = arith.constant 0 : index
    %c0_15 = arith.constant 0 : index
    %c0_16 = arith.constant 0 : index
    %c0_17 = arith.constant 0 : index
    %43 = vector.load %arg2[%c0_14, %c0_15, %c0_16, %c0_17] : memref<2x4x32x8xbf16, #tpu.memory_space<vmem>>, vector<1x4x32x8xbf16>
    %44 = vector.shape_cast %43 : vector<1x4x32x8xbf16> to vector<4x32x8xbf16>
    %cst_18 = arith.constant dense<0.000000e+00> : vector<4x8x8xf32>
    %45 = tpu.matmul %42, %44, %cst_18 {dimension_numbers = #tpu.dot_dimension_numbers<[2], [1], [1], [2], [0, 0, 0, 1, 1, 2], [0], [0]>} : vector<4x8x32xbf16>, vector<4x32x8xbf16>, vector<4x8x8xf32> -> vector<4x8x8xf32>
    %46 = vector.broadcast %6 : f32 to vector<4x8x8xf32>
    %47 = arith.mulf %45, %46 : vector<4x8x8xf32>
    %c0_19 = arith.constant 0 : index
    %c0_20 = arith.constant 0 : index
    %c0_21 = arith.constant 0 : index
    %c0_22 = arith.constant 0 : index
    %48 = vector.load %arg3[%c0_19, %c0_20, %c0_21, %c0_22] : memref<2x4x32x8xbf16, #tpu.memory_space<vmem>>, vector<1x4x32x8xbf16>
    %49 = vector.shape_cast %48 : vector<1x4x32x8xbf16> to vector<4x32x8xbf16>
    %cst_23 = arith.constant dense<0.000000e+00> : vector<4x8x8xf32>
    %50 = tpu.matmul %42, %49, %cst_23 {dimension_numbers = #tpu.dot_dimension_numbers<[2], [1], [1], [2], [0, 0, 0, 1, 1, 2], [0], [0]>} : vector<4x8x32xbf16>, vector<4x32x8xbf16>, vector<4x8x8xf32> -> vector<4x8x8xf32>
    %c0_24 = arith.constant 0 : index
    %c0_25 = arith.constant 0 : index
    %c0_26 = arith.constant 0 : index
    %c0_27 = arith.constant 0 : index
    %51 = vector.load %arg4[%c0_24, %c0_25, %c0_26, %c0_27] : memref<2x4x32x8xbf16, #tpu.memory_space<vmem>>, vector<1x4x32x8xbf16>
    %52 = vector.shape_cast %51 : vector<1x4x32x8xbf16> to vector<4x32x8xbf16>
    %cst_28 = arith.constant dense<0.000000e+00> : vector<4x8x8xf32>
    %53 = tpu.matmul %42, %52, %cst_28 {dimension_numbers = #tpu.dot_dimension_numbers<[2], [1], [1], [2], [0, 0, 0, 1, 1, 2], [0], [0]>} : vector<4x8x32xbf16>, vector<4x32x8xbf16>, vector<4x8x8xf32> -> vector<4x8x8xf32>
    %54 = arith.truncf %47 : vector<4x8x8xf32> to vector<4x8x8xbf16>
    %55 = arith.truncf %50 : vector<4x8x8xf32> to vector<4x8x8xbf16>
    %cst_29 = arith.constant dense<0.000000e+00> : vector<4x8x8xf32>
    %56 = tpu.matmul %54, %55, %cst_29 {dimension_numbers = #tpu.dot_dimension_numbers<[2], [2], [1], [1], [0, 0, 0, 1, 1, 1], [0], [0]>} : vector<4x8x8xbf16>, vector<4x8x8xbf16>, vector<4x8x8xf32> -> vector<4x8x8xf32>
    %cst_30 = arith.constant -1.000000e+30 : f32
    %57 = vector.shape_cast %5 : vector<1x8x8xi1> to vector<1x8x8xi1>
    %58 = vector.broadcast %57 : vector<1x8x8xi1> to vector<4x8x8xi1>
    %59 = vector.broadcast %cst_30 : f32 to vector<4x8x8xf32>
    %60 = arith.select %58, %56, %59 : vector<4x8x8xi1>, vector<4x8x8xf32>
    %cst_31 = arith.constant dense<0xFF800000> : vector<4x8xf32>
    %61 = vector.multi_reduction <maximumf>, %60, %cst_31 [2] : vector<4x8x8xf32> to vector<4x8xf32>
    %62 = vector.shape_cast %61 : vector<4x8xf32> to vector<4x8x1xf32>
    %63 = vector.broadcast %62 : vector<4x8x1xf32> to vector<4x8x8xf32>
    %64 = arith.subf %60, %63 : vector<4x8x8xf32>
    %65 = math.exp %64 : vector<4x8x8xf32>
    %cst_32 = arith.constant dense<0.000000e+00> : vector<4x8xf32>
    %66 = vector.multi_reduction <add>, %65, %cst_32 [2] : vector<4x8x8xf32> to vector<4x8xf32>
    %67 = vector.shape_cast %66 : vector<4x8xf32> to vector<4x8x1xf32>
    %68 = tpu.reciprocal %67 {approx = true} : vector<4x8x1xf32> -> vector<4x8x1xf32>
    %69 = vector.broadcast %68 : vector<4x8x1xf32> to vector<4x8x8xf32>
    %70 = arith.mulf %65, %69 : vector<4x8x8xf32>
    %71 = arith.truncf %70 : vector<4x8x8xf32> to vector<4x8x8xbf16>
    %72 = arith.truncf %53 : vector<4x8x8xf32> to vector<4x8x8xbf16>
    %cst_33 = arith.constant dense<0.000000e+00> : vector<4x8x8xf32>
    %73 = tpu.matmul %71, %72, %cst_33 {dimension_numbers = #tpu.dot_dimension_numbers<[2], [1], [1], [2], [0, 0, 0, 1, 1, 2], [0], [0]>} : vector<4x8x8xbf16>, vector<4x8x8xbf16>, vector<4x8x8xf32> -> vector<4x8x8xf32>
    %74 = arith.truncf %73 : vector<4x8x8xf32> to vector<4x8x8xbf16>
    %c0_34 = arith.constant 0 : index
    %c0_35 = arith.constant 0 : index
    %c0_36 = arith.constant 0 : index
    %c0_37 = arith.constant 0 : index
    %75 = vector.load %arg5[%c0_34, %c0_35, %c0_36, %c0_37] : memref<2x4x8x32xbf16, #tpu.memory_space<vmem>>, vector<1x4x8x32xbf16>
    %76 = vector.shape_cast %75 : vector<1x4x8x32xbf16> to vector<4x8x32xbf16>
    %cst_38 = arith.constant dense<0.000000e+00> : vector<4x8x32xf32>
    %77 = tpu.matmul %74, %76, %cst_38 {dimension_numbers = #tpu.dot_dimension_numbers<[2], [1], [1], [2], [0, 0, 0, 1, 1, 2], [0], [0]>} : vector<4x8x8xbf16>, vector<4x8x32xbf16>, vector<4x8x32xf32> -> vector<4x8x32xf32>
    %cst_39 = arith.constant dense<0.000000e+00> : vector<8x32xf32>
    %78 = vector.multi_reduction <add>, %77, %cst_39 [0] : vector<4x8x32xf32> to vector<8x32xf32>
    %79 = arith.addf %1, %78 : vector<8x32xf32>
    %80 = vector.broadcast %13 : vector<1x32xf32> to vector<8x32xf32>
    %81 = arith.addf %79, %80 : vector<8x32xf32>
    %cst_40 = arith.constant dense<0.000000e+00> : vector<8xf32>
    %82 = vector.multi_reduction <add>, %81, %cst_40 [1] : vector<8x32xf32> to vector<8xf32>
    %83 = vector.shape_cast %82 : vector<8xf32> to vector<8x1xf32>
    %cst_41 = arith.constant 3.200000e+01 : f32
    %84 = vector.broadcast %cst_41 : f32 to vector<8x1xf32>
    %85 = arith.divf %83, %84 : vector<8x1xf32>
    %86 = vector.broadcast %85 : vector<8x1xf32> to vector<8x32xf32>
    %87 = arith.subf %81, %86 : vector<8x32xf32>
    %88 = arith.mulf %87, %87 : vector<8x32xf32>
    %cst_42 = arith.constant dense<0.000000e+00> : vector<8xf32>
    %89 = vector.multi_reduction <add>, %88, %cst_42 [1] : vector<8x32xf32> to vector<8xf32>
    %90 = vector.shape_cast %89 : vector<8xf32> to vector<8x1xf32>
    %cst_43 = arith.constant 3.200000e+01 : f32
    %91 = vector.broadcast %cst_43 : f32 to vector<8x1xf32>
    %92 = arith.divf %90, %91 : vector<8x1xf32>
    %93 = vector.broadcast %85 : vector<8x1xf32> to vector<8x32xf32>
    %94 = arith.subf %81, %93 : vector<8x32xf32>
    %cst_44 = arith.constant 9.99999974E-6 : f32
    %95 = vector.broadcast %cst_44 : f32 to vector<8x1xf32>
    %96 = arith.addf %92, %95 : vector<8x1xf32>
    %97 = math.rsqrt %96 : vector<8x1xf32>
    %98 = vector.broadcast %97 : vector<8x1xf32> to vector<8x32xf32>
    %99 = arith.mulf %94, %98 : vector<8x32xf32>
    %100 = vector.broadcast %11 : vector<1x32xf32> to vector<8x32xf32>
    %101 = arith.mulf %99, %100 : vector<8x32xf32>
    %102 = vector.broadcast %12 : vector<1x32xf32> to vector<8x32xf32>
    %103 = arith.addf %101, %102 : vector<8x32xf32>
    %104 = arith.truncf %103 : vector<8x32xf32> to vector<8x32xbf16>
    %c0_45 = arith.constant 0 : index
    %c0_46 = arith.constant 0 : index
    %c0_47 = arith.constant 0 : index
    %105 = vector.load %arg6[%c0_45, %c0_46, %c0_47] : memref<2x32x128xbf16, #tpu.memory_space<vmem>>, vector<1x32x128xbf16>
    %106 = vector.shape_cast %105 : vector<1x32x128xbf16> to vector<32x128xbf16>
    %cst_48 = arith.constant dense<0.000000e+00> : vector<8x128xf32>
    %107 = tpu.matmul %104, %106, %cst_48 {dimension_numbers = #tpu.dot_dimension_numbers<[1], [0], [0], [1], [0, 0, 1, 1], [], []>} : vector<8x32xbf16>, vector<32x128xbf16>, vector<8x128xf32> -> vector<8x128xf32>
    %108 = vector.broadcast %16 : vector<1x128xf32> to vector<8x128xf32>
    %109 = arith.addf %107, %108 : vector<8x128xf32>
    %cst_49 = arith.constant 0.000000e+00 : f32
    %110 = vector.broadcast %cst_49 : f32 to vector<8x128xf32>
    %111 = arith.maximumf %109, %110 : vector<8x128xf32>
    %112 = arith.truncf %111 : vector<8x128xf32> to vector<8x128xbf16>
    %c0_50 = arith.constant 0 : index
    %c0_51 = arith.constant 0 : index
    %c0_52 = arith.constant 0 : index
    %113 = vector.load %arg7[%c0_50, %c0_51, %c0_52] : memref<2x128x32xbf16, #tpu.memory_space<vmem>>, vector<1x128x32xbf16>
    %114 = vector.shape_cast %113 : vector<1x128x32xbf16> to vector<128x32xbf16>
    %cst_53 = arith.constant dense<0.000000e+00> : vector<8x32xf32>
    %115 = tpu.matmul %112, %114, %cst_53 {dimension_numbers = #tpu.dot_dimension_numbers<[1], [0], [0], [1], [0, 0, 1, 1], [], []>} : vector<8x128xbf16>, vector<128x32xbf16>, vector<8x32xf32> -> vector<8x32xf32>
    %116 = arith.addf %81, %115 : vector<8x32xf32>
    %117 = vector.broadcast %14 : vector<1x32xf32> to vector<8x32xf32>
    %118 = arith.addf %116, %117 : vector<8x32xf32>
    %c1 = arith.constant 1 : index
    %c0_54 = arith.constant 0 : index
    %c0_55 = arith.constant 0 : index
    %119 = vector.load %arg8[%c1, %c0_54, %c0_55] : memref<2x8x32xf32, #tpu.memory_space<vmem>>, vector<1x8x32xf32>
    %120 = vector.shape_cast %119 : vector<1x8x32xf32> to vector<8x32xf32>
    %121 = vector.extract_strided_slice %120 {offsets = [0, 0], sizes = [1, 32], strides = [1, 1]} : vector<8x32xf32> to vector<1x32xf32>
    %122 = vector.extract_strided_slice %120 {offsets = [1, 0], sizes = [1, 32], strides = [1, 1]} : vector<8x32xf32> to vector<1x32xf32>
    %123 = vector.extract_strided_slice %120 {offsets = [2, 0], sizes = [1, 32], strides = [1, 1]} : vector<8x32xf32> to vector<1x32xf32>
    %124 = vector.extract_strided_slice %120 {offsets = [3, 0], sizes = [1, 32], strides = [1, 1]} : vector<8x32xf32> to vector<1x32xf32>
    %125 = vector.extract_strided_slice %120 {offsets = [4, 0], sizes = [1, 32], strides = [1, 1]} : vector<8x32xf32> to vector<1x32xf32>
    %126 = vector.extract_strided_slice %120 {offsets = [5, 0], sizes = [1, 32], strides = [1, 1]} : vector<8x32xf32> to vector<1x32xf32>
    %c1_56 = arith.constant 1 : index
    %c0_57 = arith.constant 0 : index
    %c0_58 = arith.constant 0 : index
    %127 = vector.load %arg9[%c1_56, %c0_57, %c0_58] : memref<2x1x128xf32, #tpu.memory_space<vmem>>, vector<1x1x128xf32>
    %128 = vector.shape_cast %127 : vector<1x1x128xf32> to vector<1x128xf32>
    %cst_59 = arith.constant dense<0.000000e+00> : vector<8xf32>
    %129 = vector.multi_reduction <add>, %118, %cst_59 [1] : vector<8x32xf32> to vector<8xf32>
    %130 = vector.shape_cast %129 : vector<8xf32> to vector<8x1xf32>
    %cst_60 = arith.constant 3.200000e+01 : f32
    %131 = vector.broadcast %cst_60 : f32 to vector<8x1xf32>
    %132 = arith.divf %130, %131 : vector<8x1xf32>
    %133 = vector.broadcast %132 : vector<8x1xf32> to vector<8x32xf32>
    %134 = arith.subf %118, %133 : vector<8x32xf32>
    %135 = arith.mulf %134, %134 : vector<8x32xf32>
    %cst_61 = arith.constant dense<0.000000e+00> : vector<8xf32>
    %136 = vector.multi_reduction <add>, %135, %cst_61 [1] : vector<8x32xf32> to vector<8xf32>
    %137 = vector.shape_cast %136 : vector<8xf32> to vector<8x1xf32>
    %cst_62 = arith.constant 3.200000e+01 : f32
    %138 = vector.broadcast %cst_62 : f32 to vector<8x1xf32>
    %139 = arith.divf %137, %138 : vector<8x1xf32>
    %140 = vector.broadcast %132 : vector<8x1xf32> to vector<8x32xf32>
    %141 = arith.subf %118, %140 : vector<8x32xf32>
    %cst_63 = arith.constant 9.99999974E-6 : f32
    %142 = vector.broadcast %cst_63 : f32 to vector<8x1xf32>
    %143 = arith.addf %139, %142 : vector<8x1xf32>
    %144 = math.rsqrt %143 : vector<8x1xf32>
    %145 = vector.broadcast %144 : vector<8x1xf32> to vector<8x32xf32>
    %146 = arith.mulf %141, %145 : vector<8x32xf32>
    %147 = vector.broadcast %121 : vector<1x32xf32> to vector<8x32xf32>
    %148 = arith.mulf %146, %147 : vector<8x32xf32>
    %149 = vector.broadcast %122 : vector<1x32xf32> to vector<8x32xf32>
    %150 = arith.addf %148, %149 : vector<8x32xf32>
    %151 = arith.truncf %150 : vector<8x32xf32> to vector<8x32xbf16>
    %152 = vector.shape_cast %151 : vector<8x32xbf16> to vector<1x8x32xbf16>
    %153 = vector.shape_cast %152 : vector<1x8x32xbf16> to vector<1x8x32xbf16>
    %154 = vector.broadcast %153 : vector<1x8x32xbf16> to vector<4x8x32xbf16>
    %c1_64 = arith.constant 1 : index
    %c0_65 = arith.constant 0 : index
    %c0_66 = arith.constant 0 : index
    %c0_67 = arith.constant 0 : index
    %155 = vector.load %arg2[%c1_64, %c0_65, %c0_66, %c0_67] : memref<2x4x32x8xbf16, #tpu.memory_space<vmem>>, vector<1x4x32x8xbf16>
    %156 = vector.shape_cast %155 : vector<1x4x32x8xbf16> to vector<4x32x8xbf16>
    %cst_68 = arith.constant dense<0.000000e+00> : vector<4x8x8xf32>
    %157 = tpu.matmul %154, %156, %cst_68 {dimension_numbers = #tpu.dot_dimension_numbers<[2], [1], [1], [2], [0, 0, 0, 1, 1, 2], [0], [0]>} : vector<4x8x32xbf16>, vector<4x32x8xbf16>, vector<4x8x8xf32> -> vector<4x8x8xf32>
    %158 = vector.broadcast %6 : f32 to vector<4x8x8xf32>
    %159 = arith.mulf %157, %158 : vector<4x8x8xf32>
    %c1_69 = arith.constant 1 : index
    %c0_70 = arith.constant 0 : index
    %c0_71 = arith.constant 0 : index
    %c0_72 = arith.constant 0 : index
    %160 = vector.load %arg3[%c1_69, %c0_70, %c0_71, %c0_72] : memref<2x4x32x8xbf16, #tpu.memory_space<vmem>>, vector<1x4x32x8xbf16>
    %161 = vector.shape_cast %160 : vector<1x4x32x8xbf16> to vector<4x32x8xbf16>
    %cst_73 = arith.constant dense<0.000000e+00> : vector<4x8x8xf32>
    %162 = tpu.matmul %154, %161, %cst_73 {dimension_numbers = #tpu.dot_dimension_numbers<[2], [1], [1], [2], [0, 0, 0, 1, 1, 2], [0], [0]>} : vector<4x8x32xbf16>, vector<4x32x8xbf16>, vector<4x8x8xf32> -> vector<4x8x8xf32>
    %c1_74 = arith.constant 1 : index
    %c0_75 = arith.constant 0 : index
    %c0_76 = arith.constant 0 : index
    %c0_77 = arith.constant 0 : index
    %163 = vector.load %arg4[%c1_74, %c0_75, %c0_76, %c0_77] : memref<2x4x32x8xbf16, #tpu.memory_space<vmem>>, vector<1x4x32x8xbf16>
    %164 = vector.shape_cast %163 : vector<1x4x32x8xbf16> to vector<4x32x8xbf16>
    %cst_78 = arith.constant dense<0.000000e+00> : vector<4x8x8xf32>
    %165 = tpu.matmul %154, %164, %cst_78 {dimension_numbers = #tpu.dot_dimension_numbers<[2], [1], [1], [2], [0, 0, 0, 1, 1, 2], [0], [0]>} : vector<4x8x32xbf16>, vector<4x32x8xbf16>, vector<4x8x8xf32> -> vector<4x8x8xf32>
    %166 = arith.truncf %159 : vector<4x8x8xf32> to vector<4x8x8xbf16>
    %167 = arith.truncf %162 : vector<4x8x8xf32> to vector<4x8x8xbf16>
    %cst_79 = arith.constant dense<0.000000e+00> : vector<4x8x8xf32>
    %168 = tpu.matmul %166, %167, %cst_79 {dimension_numbers = #tpu.dot_dimension_numbers<[2], [2], [1], [1], [0, 0, 0, 1, 1, 1], [0], [0]>} : vector<4x8x8xbf16>, vector<4x8x8xbf16>, vector<4x8x8xf32> -> vector<4x8x8xf32>
    %cst_80 = arith.constant -1.000000e+30 : f32
    %169 = vector.shape_cast %5 : vector<1x8x8xi1> to vector<1x8x8xi1>
    %170 = vector.broadcast %169 : vector<1x8x8xi1> to vector<4x8x8xi1>
    %171 = vector.broadcast %cst_80 : f32 to vector<4x8x8xf32>
    %172 = arith.select %170, %168, %171 : vector<4x8x8xi1>, vector<4x8x8xf32>
    %cst_81 = arith.constant dense<0xFF800000> : vector<4x8xf32>
    %173 = vector.multi_reduction <maximumf>, %172, %cst_81 [2] : vector<4x8x8xf32> to vector<4x8xf32>
    %174 = vector.shape_cast %173 : vector<4x8xf32> to vector<4x8x1xf32>
    %175 = vector.broadcast %174 : vector<4x8x1xf32> to vector<4x8x8xf32>
    %176 = arith.subf %172, %175 : vector<4x8x8xf32>
    %177 = math.exp %176 : vector<4x8x8xf32>
    %cst_82 = arith.constant dense<0.000000e+00> : vector<4x8xf32>
    %178 = vector.multi_reduction <add>, %177, %cst_82 [2] : vector<4x8x8xf32> to vector<4x8xf32>
    %179 = vector.shape_cast %178 : vector<4x8xf32> to vector<4x8x1xf32>
    %180 = tpu.reciprocal %179 {approx = true} : vector<4x8x1xf32> -> vector<4x8x1xf32>
    %181 = vector.broadcast %180 : vector<4x8x1xf32> to vector<4x8x8xf32>
    %182 = arith.mulf %177, %181 : vector<4x8x8xf32>
    %183 = arith.truncf %182 : vector<4x8x8xf32> to vector<4x8x8xbf16>
    %184 = arith.truncf %165 : vector<4x8x8xf32> to vector<4x8x8xbf16>
    %cst_83 = arith.constant dense<0.000000e+00> : vector<4x8x8xf32>
    %185 = tpu.matmul %183, %184, %cst_83 {dimension_numbers = #tpu.dot_dimension_numbers<[2], [1], [1], [2], [0, 0, 0, 1, 1, 2], [0], [0]>} : vector<4x8x8xbf16>, vector<4x8x8xbf16>, vector<4x8x8xf32> -> vector<4x8x8xf32>
    %186 = arith.truncf %185 : vector<4x8x8xf32> to vector<4x8x8xbf16>
    %c1_84 = arith.constant 1 : index
    %c0_85 = arith.constant 0 : index
    %c0_86 = arith.constant 0 : index
    %c0_87 = arith.constant 0 : index
    %187 = vector.load %arg5[%c1_84, %c0_85, %c0_86, %c0_87] : memref<2x4x8x32xbf16, #tpu.memory_space<vmem>>, vector<1x4x8x32xbf16>
    %188 = vector.shape_cast %187 : vector<1x4x8x32xbf16> to vector<4x8x32xbf16>
    %cst_88 = arith.constant dense<0.000000e+00> : vector<4x8x32xf32>
    %189 = tpu.matmul %186, %188, %cst_88 {dimension_numbers = #tpu.dot_dimension_numbers<[2], [1], [1], [2], [0, 0, 0, 1, 1, 2], [0], [0]>} : vector<4x8x8xbf16>, vector<4x8x32xbf16>, vector<4x8x32xf32> -> vector<4x8x32xf32>
    %cst_89 = arith.constant dense<0.000000e+00> : vector<8x32xf32>
    %190 = vector.multi_reduction <add>, %189, %cst_89 [0] : vector<4x8x32xf32> to vector<8x32xf32>
    %191 = arith.addf %118, %190 : vector<8x32xf32>
    %192 = vector.broadcast %125 : vector<1x32xf32> to vector<8x32xf32>
    %193 = arith.addf %191, %192 : vector<8x32xf32>
    %cst_90 = arith.constant dense<0.000000e+00> : vector<8xf32>
    %194 = vector.multi_reduction <add>, %193, %cst_90 [1] : vector<8x32xf32> to vector<8xf32>
    %195 = vector.shape_cast %194 : vector<8xf32> to vector<8x1xf32>
    %cst_91 = arith.constant 3.200000e+01 : f32
    %196 = vector.broadcast %cst_91 : f32 to vector<8x1xf32>
    %197 = arith.divf %195, %196 : vector<8x1xf32>
    %198 = vector.broadcast %197 : vector<8x1xf32> to vector<8x32xf32>
    %199 = arith.subf %193, %198 : vector<8x32xf32>
    %200 = arith.mulf %199, %199 : vector<8x32xf32>
    %cst_92 = arith.constant dense<0.000000e+00> : vector<8xf32>
    %201 = vector.multi_reduction <add>, %200, %cst_92 [1] : vector<8x32xf32> to vector<8xf32>
    %202 = vector.shape_cast %201 : vector<8xf32> to vector<8x1xf32>
    %cst_93 = arith.constant 3.200000e+01 : f32
    %203 = vector.broadcast %cst_93 : f32 to vector<8x1xf32>
    %204 = arith.divf %202, %203 : vector<8x1xf32>
    %205 = vector.broadcast %197 : vector<8x1xf32> to vector<8x32xf32>
    %206 = arith.subf %193, %205 : vector<8x32xf32>
    %cst_94 = arith.constant 9.99999974E-6 : f32
    %207 = vector.broadcast %cst_94 : f32 to vector<8x1xf32>
    %208 = arith.addf %204, %207 : vector<8x1xf32>
    %209 = math.rsqrt %208 : vector<8x1xf32>
    %210 = vector.broadcast %209 : vector<8x1xf32> to vector<8x32xf32>
    %211 = arith.mulf %206, %210 : vector<8x32xf32>
    %212 = vector.broadcast %123 : vector<1x32xf32> to vector<8x32xf32>
    %213 = arith.mulf %211, %212 : vector<8x32xf32>
    %214 = vector.broadcast %124 : vector<1x32xf32> to vector<8x32xf32>
    %215 = arith.addf %213, %214 : vector<8x32xf32>
    %216 = arith.truncf %215 : vector<8x32xf32> to vector<8x32xbf16>
    %c1_95 = arith.constant 1 : index
    %c0_96 = arith.constant 0 : index
    %c0_97 = arith.constant 0 : index
    %217 = vector.load %arg6[%c1_95, %c0_96, %c0_97] : memref<2x32x128xbf16, #tpu.memory_space<vmem>>, vector<1x32x128xbf16>
    %218 = vector.shape_cast %217 : vector<1x32x128xbf16> to vector<32x128xbf16>
    %cst_98 = arith.constant dense<0.000000e+00> : vector<8x128xf32>
    %219 = tpu.matmul %216, %218, %cst_98 {dimension_numbers = #tpu.dot_dimension_numbers<[1], [0], [0], [1], [0, 0, 1, 1], [], []>} : vector<8x32xbf16>, vector<32x128xbf16>, vector<8x128xf32> -> vector<8x128xf32>
    %220 = vector.broadcast %128 : vector<1x128xf32> to vector<8x128xf32>
    %221 = arith.addf %219, %220 : vector<8x128xf32>
    %cst_99 = arith.constant 0.000000e+00 : f32
    %222 = vector.broadcast %cst_99 : f32 to vector<8x128xf32>
    %223 = arith.maximumf %221, %222 : vector<8x128xf32>
    %224 = arith.truncf %223 : vector<8x128xf32> to vector<8x128xbf16>
    %c1_100 = arith.constant 1 : index
    %c0_101 = arith.constant 0 : index
    %c0_102 = arith.constant 0 : index
    %225 = vector.load %arg7[%c1_100, %c0_101, %c0_102] : memref<2x128x32xbf16, #tpu.memory_space<vmem>>, vector<1x128x32xbf16>
    %226 = vector.shape_cast %225 : vector<1x128x32xbf16> to vector<128x32xbf16>
    %cst_103 = arith.constant dense<0.000000e+00> : vector<8x32xf32>
    %227 = tpu.matmul %224, %226, %cst_103 {dimension_numbers = #tpu.dot_dimension_numbers<[1], [0], [0], [1], [0, 0, 1, 1], [], []>} : vector<8x128xbf16>, vector<128x32xbf16>, vector<8x32xf32> -> vector<8x32xf32>
    %228 = arith.addf %193, %227 : vector<8x32xf32>
    %229 = vector.broadcast %126 : vector<1x32xf32> to vector<8x32xf32>
    %230 = arith.addf %228, %229 : vector<8x32xf32>
    %c0_104 = arith.constant 0 : index
    %c0_105 = arith.constant 0 : index
    %231 = vector.load %arg10[%c0_104, %c0_105] : memref<2x32xf32, #tpu.memory_space<vmem>>, vector<1x32xf32>
    %c1_106 = arith.constant 1 : index
    %c0_107 = arith.constant 0 : index
    %232 = vector.load %arg10[%c1_106, %c0_107] : memref<2x32xf32, #tpu.memory_space<vmem>>, vector<1x32xf32>
    %cst_108 = arith.constant dense<0.000000e+00> : vector<8xf32>
    %233 = vector.multi_reduction <add>, %230, %cst_108 [1] : vector<8x32xf32> to vector<8xf32>
    %234 = vector.shape_cast %233 : vector<8xf32> to vector<8x1xf32>
    %cst_109 = arith.constant 3.200000e+01 : f32
    %235 = vector.broadcast %cst_109 : f32 to vector<8x1xf32>
    %236 = arith.divf %234, %235 : vector<8x1xf32>
    %237 = vector.broadcast %236 : vector<8x1xf32> to vector<8x32xf32>
    %238 = arith.subf %230, %237 : vector<8x32xf32>
    %239 = arith.mulf %238, %238 : vector<8x32xf32>
    %cst_110 = arith.constant dense<0.000000e+00> : vector<8xf32>
    %240 = vector.multi_reduction <add>, %239, %cst_110 [1] : vector<8x32xf32> to vector<8xf32>
    %241 = vector.shape_cast %240 : vector<8xf32> to vector<8x1xf32>
    %cst_111 = arith.constant 3.200000e+01 : f32
    %242 = vector.broadcast %cst_111 : f32 to vector<8x1xf32>
    %243 = arith.divf %241, %242 : vector<8x1xf32>
    %244 = vector.broadcast %236 : vector<8x1xf32> to vector<8x32xf32>
    %245 = arith.subf %230, %244 : vector<8x32xf32>
    %cst_112 = arith.constant 9.99999974E-6 : f32
    %246 = vector.broadcast %cst_112 : f32 to vector<8x1xf32>
    %247 = arith.addf %243, %246 : vector<8x1xf32>
    %248 = math.rsqrt %247 : vector<8x1xf32>
    %249 = vector.broadcast %248 : vector<8x1xf32> to vector<8x32xf32>
    %250 = arith.mulf %245, %249 : vector<8x32xf32>
    %251 = vector.broadcast %231 : vector<1x32xf32> to vector<8x32xf32>
    %252 = arith.mulf %250, %251 : vector<8x32xf32>
    %253 = vector.broadcast %232 : vector<1x32xf32> to vector<8x32xf32>
    %254 = arith.addf %252, %253 : vector<8x32xf32>
    %255 = arith.truncf %254 : vector<8x32xf32> to vector<8x32xbf16>
    %c0_113 = arith.constant 0 : index
    %c0_114 = arith.constant 0 : index
    %256 = vector.load %arg11[%c0_113, %c0_114] : memref<32x128xbf16, #tpu.memory_space<vmem>>, vector<32x128xbf16>
    %cst_115 = arith.constant dense<0.000000e+00> : vector<8x128xf32>
    %257 = tpu.matmul %255, %256, %cst_115 {dimension_numbers = #tpu.dot_dimension_numbers<[1], [0], [0], [1], [0, 0, 1, 1], [], []>} : vector<8x32xbf16>, vector<32x128xbf16>, vector<8x128xf32> -> vector<8x128xf32>
    %c0_116 = arith.constant 0 : index
    %c0_117 = arith.constant 0 : index
    %258 = vector.load %arg12[%c0_116, %c0_117] : memref<1x128xf32, #tpu.memory_space<vmem>>, vector<1x128xf32>
    %259 = vector.broadcast %258 : vector<1x128xf32> to vector<8x128xf32>
    %260 = arith.addf %257, %259 : vector<8x128xf32>
    %c0_118 = arith.constant 0 : index
    %c0_119 = arith.constant 0 : index
    %c0_120 = arith.constant 0 : index
    %261 = vector.load %arg13[%c0_118, %c0_119, %c0_120] : memref<1x8x128xf32, #tpu.memory_space<vmem>>, vector<1x8x128xf32>
    %262 = vector.shape_cast %261 : vector<1x8x128xf32> to vector<8x128xf32>
    %263 = vector.shape_cast %260 : vector<8x128xf32> to vector<1x8x128xf32>
    tpu.vector_store %arg13[%c0_118, %c0_119, %c0_120], %263 {strides = array<i32>} : memref<1x8x128xf32, #tpu.memory_space<vmem>>, vector<1x8x128xf32>,
    return
  }
  func.func @transform_0(%arg0: i32) -> (i32, i32, i32) {
    %c0_i32 = arith.constant 0 : i32
    %c0_i32_0 = arith.constant 0 : i32
    %c0_i32_1 = arith.constant 0 : i32
    return %arg0, %c0_i32, %c0_i32_0 : i32, i32, i32
  }
  func.func @transform_1(%arg0: i32) -> (i32, i32, i32, i32) {
    %c0_i32 = arith.constant 0 : i32
    %c0_i32_0 = arith.constant 0 : i32
    %c0_i32_1 = arith.constant 0 : i32
    %c0_i32_2 = arith.constant 0 : i32
    %c0_i32_3 = arith.constant 0 : i32
    return %c0_i32, %c0_i32_0, %c0_i32_1, %c0_i32_2 : i32, i32, i32, i32
  }
  func.func @transform_2(%arg0: i32) -> (i32, i32, i32, i32) {
    %c0_i32 = arith.constant 0 : i32
    %c0_i32_0 = arith.constant 0 : i32
    %c0_i32_1 = arith.constant 0 : i32
    %c0_i32_2 = arith.constant 0 : i32
    %c0_i32_3 = arith.constant 0 : i32
    return %c0_i32, %c0_i32_0, %c0_i32_1, %c0_i32_2 : i32, i32, i32, i32
  }
  func.func @transform_3(%arg0: i32) -> (i32, i32, i32, i32) {
    %c0_i32 = arith.constant 0 : i32
    %c0_i32_0 = arith.constant 0 : i32
    %c0_i32_1 = arith.constant 0 : i32
    %c0_i32_2 = arith.constant 0 : i32
    %c0_i32_3 = arith.constant 0 : i32
    return %c0_i32, %c0_i32_0, %c0_i32_1, %c0_i32_2 : i32, i32, i32, i32
  }
  func.func @transform_4(%arg0: i32) -> (i32, i32, i32, i32) {
    %c0_i32 = arith.constant 0 : i32
    %c0_i32_0 = arith.constant 0 : i32
    %c0_i32_1 = arith.constant 0 : i32
    %c0_i32_2 = arith.constant 0 : i32
    %c0_i32_3 = arith.constant 0 : i32
    return %c0_i32, %c0_i32_0, %c0_i32_1, %c0_i32_2 : i32, i32, i32, i32
  }
  func.func @transform_5(%arg0: i32) -> (i32, i32, i32) {
    %c0_i32 = arith.constant 0 : i32
    %c0_i32_0 = arith.constant 0 : i32
    %c0_i32_1 = arith.constant 0 : i32
    %c0_i32_2 = arith.constant 0 : i32
    return %c0_i32, %c0_i32_0, %c0_i32_1 : i32, i32, i32
  }
  func.func @transform_6(%arg0: i32) -> (i32, i32, i32) {
    %c0_i32 = arith.constant 0 : i32
    %c0_i32_0 = arith.constant 0 : i32
    %c0_i32_1 = arith.constant 0 : i32
    %c0_i32_2 = arith.constant 0 : i32
    return %c0_i32, %c0_i32_0, %c0_i32_1 : i32, i32, i32
  }
  func.func @transform_7(%arg0: i32) -> (i32, i32, i32) {
    %c0_i32 = arith.constant 0 : i32
    %c0_i32_0 = arith.constant 0 : i32
    %c0_i32_1 = arith.constant 0 : i32
    %c0_i32_2 = arith.constant 0 : i32
    return %c0_i32, %c0_i32_0, %c0_i32_1 : i32, i32, i32
  }
  func.func @transform_8(%arg0: i32) -> (i32, i32, i32) {
    %c0_i32 = arith.constant 0 : i32
    %c0_i32_0 = arith.constant 0 : i32
    %c0_i32_1 = arith.constant 0 : i32
    %c0_i32_2 = arith.constant 0 : i32
    return %c0_i32, %c0_i32_0, %c0_i32_1 : i32, i32, i32
  }
  func.func @transform_9(%arg0: i32) -> (i32, i32) {
    %c0_i32 = arith.constant 0 : i32
    %c0_i32_0 = arith.constant 0 : i32
    %c0_i32_1 = arith.constant 0 : i32
    return %c0_i32, %c0_i32_0 : i32, i32
  }
  func.func @transform_10(%arg0: i32) -> (i32, i32) {
    %c0_i32 = arith.constant 0 : i32
    %c0_i32_0 = arith.constant 0 : i32
    %c0_i32_1 = arith.constant 0 : i32
    return %c0_i32, %c0_i32_0 : i32, i32
  }
  func.func @transform_11(%arg0: i32) -> (i32, i32) {
    %c0_i32 = arith.constant 0 : i32
    %c0_i32_0 = arith.constant 0 : i32
    %c0_i32_1 = arith.constant 0 : i32
    return %c0_i32, %c0_i32_0 : i32, i32
  }
  func.func @transform_12(%arg0: i32) -> (i32, i32, i32) {
    %c0_i32 = arith.constant 0 : i32
    %c0_i32_0 = arith.constant 0 : i32
    %c0_i32_1 = arith.constant 0 : i32
    return %arg0, %c0_i32, %c0_i32_0 : i32, i32, i32
  }
}

</mosaic_0001>

<bundles_post_ra>
// kernel: gpt_forward.1
= control target key start
LH: loop header
LB: loop body
LE: loop exit
PB: predicated region body
PF: predicated region fallthrough
CT: control target
= control target key end

     0   :  { %s5515_s0 = inlined_call_operand.vmem [shape: f32[2,8,32], index: 0, kind: input, shape index: {}]   ;;  %s5516_s1 = inlined_call_operand.vmem [shape: bf16[2,4,32,8], index: 1, kind: input, shape index: {}]   ;;  %s5517_s2 = inlined_call_operand.vmem [shape: bf16[2,4,32,8], index: 2, kind: input, shape index: {}]   ;;  %s5518_s3 = inlined_call_operand.vmem [shape: bf16[2,4,32,8], index: 3, kind: input, shape index: {}]   ;;  %s5519_s4 = inlined_call_operand.vmem [shape: bf16[2,4,8,32], index: 4, kind: input, shape index: {}]   ;;  %s5520_s5 = inlined_call_operand.vmem [shape: bf16[2,32,128], index: 5, kind: input, shape index: {}]   ;;  %s5521_s6 = inlined_call_operand.vmem [shape: bf16[2,128,32], index: 6, kind: input, shape index: {}]   ;;  %s5522_s7 = inlined_call_operand.vmem [shape: f32[2,8,32], index: 7, kind: input, shape index: {}]   ;;  %s5523_s8 = inlined_call_operand.vmem [shape: f32[2,1,128], index: 8, kind: input, shape index: {}]   ;;  %s5524_s9 = inlined_call_operand.vmem [shape: f32[2,32], index: 9, kind: input, shape index: {}]   ;;  %s5525_s10 = inlined_call_operand.vmem [shape: bf16[32,128], index: 10, kind: input, shape index: {}]   ;;  %s5526_s11 = inlined_call_operand.vmem [shape: f32[1,128], index: 11, kind: input, shape index: {}]   ;;  %s5527_s12 = inlined_call_operand.hbm [shape: f32[2,8,128], index: 12, kind: output, shape index: {}]  }
   0x1   :  { %5528 = sst [smem:[#allocation5_spill]] %s5515_s0 }
   0x2   :  { %5529 = sst [smem:[#allocation6_spill]] %s5516_s1 }
   0x3   :  { %17 = vsyncpa [#allocation3], 0 }
   0x4   :  { %19 = vsyncpa [#allocation3 + $0x1], 0  ;;  %s4722_s21 = smov 0   ;;  %s4724_s22 = smov 0  }
   0x5   :  { %s4726_s23 = smov 0   ;;  %s4728_s24 = smov 0  }
   0x6 LB: > { %s4743_s25 = sadd.s32 4294967295, %s4652_s24   ;;  %s3682_s26 = sadd.s32 4294967294, %s4652_s24   ;;  %s4652_s24 = sphi %s4728_s24, %s5539_s24   ;;  %s4648_s23 = sphi %s4726_s23, %s5538_s23   ;;  %s4644_s22 = sphi %s4724_s22, %s5537_s22   ;;  %s4640_s21 = sphi %s4722_s21, %s5536_s21  }
   0x7   : > { %s4747_s27 = sadd.s32 1, %s4652_s24   ;;  %s289_s28 = sadd.s32 1, %s4648_s23 }
   0x8   : > { %s286_s29 = ssub.s32 %s4652_s24, %s4747_s27  ;;  %p299_p0 = scmp.ne.s32.totalorder %s4648_s23, %s4644_s22 }
   0x9   : > { %p287_p1 = scmp.eq.s32.totalorder %s286_s29, 0  ;;  %p300_p2 = scmp.eq.s32.totalorder %s4743_s25, 1 }
   0xa   : > { %p305_p3 = scmp.ne.s32.totalorder %s4644_s22, %s4640_s21  ;;  %p306_p4 = scmp.eq.s32.totalorder %s3682_s26, 1 }
   0xb   : > { %s4758_s30 = scalar_select %p287_p1, %s4648_s23, %s289_s28  }
   0xc   : > { %p4760_p5 = por %p300_p2, %p299_p0  ;;  %p4764_p6 = por %p306_p4, %p305_p3 }
   0xd   : > { %p3685_p7 = scmp.ge.s32.totalorder %s4652_s24, 1  ;;  %p364_p8 = scmp.lt.s32.totalorder %s4652_s24, 3 }
   0xf   : > { %p365_p9 = pnand %p3685_p7, %p364_p8 }
  0x10   : > { %p405_p10 = scmp.lt.s32.totalorder (!%p365_p9), %s4743_s25, 1  ;;  %s5532_s0 = sld [smem:[#allocation5_spill]] (!%p365_p9) }
  0x11   : > { %368 = sbr.rel (%p365_p9) target bundleno = 4862 (0x12fe), region = 68  ;;  %s5533_s1 = sld [smem:[#allocation6_spill]] (!%p365_p9) }
  0x12   : > { %s402_s17 = sand.u32 (!%p365_p9), 1, %s4644_s22   ;;  %s3889_s26 = sshll.u32 (!%p365_p9), %s4743_s25, 7 }
  0x13   : > { %s3686_s18 = sshll.u32 (!%p365_p9), %s402_s17, 3 }
  0x14   : > { %s404_s28 = scalar_lea.vmem (!%p365_p9), [#allocation2], %s3686_s18 }
  0x15   : > { %s3623_s29 = sshll.u32 (!%p365_p9), %s404_s28, 4  ;;  %s5476_s29 = int_to_ptr.vmem [resolvable:$true] %s3623_s29 }
  0x16   : > { %s406_s15 = scalar_select %p405_p10, %s4743_s25, 1  ;;  %vm418_vm0 = vcmask 261120   ;;  %v4654_v9 = vmov 0.0   ;;  %vm4655_vm1 = vmmov 0   ;;  %v411_v15 = vlaneseq  ;;  %v4810_v18 = vld [vmem:[%s5522_s7] sm:$0xff]  ;;  %v4485_v27 = vld [vmem:[%s5517_s2 + $0x8] sm:$0xff]  }
  0x17   : > { %v4480_v7 = vld [vmem:[%s5533_s1 + $0x8] sm:$0xff]   ;;  %4039 = vmatprep.subr.bf16.mxu1 %v4654_v9  ;;  %4055 = vmatprep.subr.bf16.mxu0 %v4654_v9  ;;  %v4482_v10 = vld [vmem:[%s5533_s1] sm:$0xff]   ;;  %v4484_v26 = vld [vmem:[%s5533_s1 + $0x18] sm:$0xff]   ;;  %vm1131_vm2 = vcmask 64512   ;;  %vm1377_vm3 = vcmask 1043456   ;;  %s4592_s20 = scalar_lea.vmem %s5476_s29, 128 }
  0x18   : > { %s3687_s16 = sshll.u32 %s406_s15, 3  ;;  %v4481_v8 = vld [vmem:[%s5533_s1 + $0x28] sm:$0xff]   ;;  %4040 = vmatpush3.bf16.msra.mxu1 %v4480_v7  ;;  %v4483_v11 = vld [vmem:[%s5533_s1 + $0x20] sm:$0xff]   ;;  %4043 = vmatprep.mubr.msk.bf16.mxu1 %vm4655_vm1, %v4654_v9  ;;  %v4804_v16 = vshrl.u32 %v411_v15, 7  ;;  %v4486_v29 = vld [vmem:[%s5533_s1 + $0x10] sm:$0xff]   ;;  %p4593_p11 = scmp.ne.s32.totalorder %s5476_s29, %s4592_s20 }
  0x19   : > { %s408_s19 = scalar_lea.vmem %s5532_s0, %s3687_s16  ;;  %4056 = vmatpush3.bf16.msra.mxu0 %v4481_v8  ;;  %4041 = vmatprep.subr.bf16.mxu1 %v4654_v9  ;;  %v4487_v30 = vld [vmem:[%s5517_s2] sm:$0xff]   ;;  %v4488_v31 = vld [vmem:[%s5533_s1 + $0x38] sm:$0xff]   ;;  %v4489_v32 = vld [vmem:[%s5517_s2 + $0x28] sm:$0xff]   ;;  %s5474_s16 = scalar_lea.hbm %s5527_s12, %s3889_s26 }
  0x1a   : > { %v4775_v0 = vld [vmem:[%s408_s19] sm:$0xff]  ;;  %4057 = vmatprep.subr.bf16.mxu0 %v4654_v9  ;;  %4059 = vmatprep.mubr.msk.bf16.mxu0 %vm4655_vm1, %v4654_v9  ;;  %v435_v17 = vsub.s32 0, %v4804_v16  ;;  %v440_v19 = vsub.s32 1, %v4804_v16  ;;  %v4490_v33 = vld [vmem:[%s5533_s1 + $0x30] sm:$0xff]   ;;  %v4492_v35 = vld [vmem:[%s5517_s2 + $0x18] sm:$0xff]   ;;  %s3610_s19 = scalar_lea.sflag [#allocation3], %s402_s17  ;;  %p4594_p12 = pnand %p4593_p11, %p4760_p5 }
  0x1b   : > { %v419_v1 = vsel %vm418_vm0, %v4775_v0, 0.0  ;;  %v4491_v34 = vld [vmem:[%s5517_s2 + $0x20] sm:$0xff]   ;;  %v4493_v36 = vld [vmem:[%s5518_s3 + $0x8] sm:$0xff]   ;;  %v4494_v37 = vld [vmem:[%s5517_s2 + $0x10] sm:$0xff]   ;;  %s4656_s25 = smov [#allocation2]  }
  0x1c   : > { %420 = vadd.xlane.f32.xlu0 %v419_v1  ;;  %4042 = vmatpush3.bf16.msra.mxu1 %v4482_v10  ;;  %v436_v20 = vrot.slane %v4810_v18, %v435_v17  ;;  %v441_v22 = vrot.slane %v4810_v18, %v440_v19  ;;  %v4495_v38 = vld [vmem:[%s5518_s3] sm:$0xff]   ;;  %v4496_v39 = vld [vmem:[%s5517_s2 + $0x38] sm:$0xff]   ;;  %v4497_v40 = vld [vmem:[%s5518_s3 + $0x28] sm:$0xff]   ;;  %p4595_p13 = pneg %p4594_p12  ;;  %s4596_s18 = sshll.u32 %s4656_s25, 4  ;;  %s4597_s18 = int_to_ptr.vmem [resolvable:$false] %s4596_s18 }
  0x1d   : > { %4058 = vmatpush3.bf16.msra.mxu0 %v4483_v11  ;;  %4047 = vmatprep.subr.bf16.mxu1 %v4654_v9  ;;  %v4498_v41 = vld [vmem:[%s5517_s2 + $0x30] sm:$0xff]   ;;  %v4499_v42 = vld [vmem:[%s5518_s3 + $0x20] sm:$0xff]   ;;  %v4500_v43 = vld [vmem:[%s5518_s3 + $0x18] sm:$0xff]   ;;  %s4598_s0 = scalar_lea.vmem %s4597_s18, 256  ;;  %p4599_p0 = scmp.lt.s32.totalorder %s5476_s29, %s4597_s18 }
  0x1e   : > { %4071 = vmatprep.subr.bf16.mxu0 %v4654_v9  ;;  %v4501_v44 = vld [vmem:[%s5518_s3 + $0x10] sm:$0xff]   ;;  %v4502_v45 = vld [vmem:[%s5518_s3 + $0x38] sm:$0xff]   ;;  %p4600_p1 = scmp.lt.s32.totalorder %s4598_s0, %s4592_s20 }
  0x1f   : > { %v4503_v46 = vld [vmem:[%s5518_s3 + $0x30] sm:$0xff]  }
  0x20   : > { %p4601_p2 = por %p4600_p1, %p4599_p0 }
  0x22   : > { %p4602_p3 = pnand %p4601_p2, %p4595_p13 }
  0xa5   : > { %v421_v2 = vpop.xlane.xlu0 %420 }
  0xa6   : > { %v423_v3 = vmul.f32 0.03125, %v421_v2 }
  0xa8   : > { %v424_v4 = vsub.f32 %v4775_v0, %v423_v3 }
  0xaa   : > { %v425_v5 = vmul.f32 %v424_v4, %v424_v4 }
  0xac   : > { %v426_v6 = vsel %vm418_vm0, %v425_v5, 0.0 }
  0xad   : > { %427 = vadd.xlane.f32.xlu0 %v426_v6 }
 0x136   : > { %v428_v12 = vpop.xlane.xlu0 %427 }
 0x137   : > { %v429_v13 = vmul.f32 0.03125, %v428_v12 }
 0x139   : > { %v430_v14 = vadd.f32 1e-05, %v429_v13 }
 0x13b   : > { %4550 = vrsqrt.f32 %v430_v14 }
 0x148   : > { %v4551_v21 = vpop.eup %4550 }
 0x149   : > { %v432_v23 = vmul.f32 %v4551_v21, %v424_v4 }
 0x14b   : > { %v437_v24 = vmul.f32 %v436_v20, %v432_v23 }
 0x14d   : > { %v442_v25 = vadd.f32 %v441_v22, %v437_v24 }
 0x14f   : > { %v4825_v28 = vpack.c.bf16 %v442_v25, %v442_v25 }
 0x151   : > { %4044 = vmatmul.mubr.msk.bf16.vlgmr.msra.gmra.mxu1 %vm418_vm0, %v4825_v28  ;;  %4060 = vmatmul.mubr.msk.bf16.vlgmr.msra.gmra.mxu0 %vm418_vm0, %v4825_v28 }
 0x152   : > { %4048 = vmatpush3.bf16.msra.mxu1 %v4484_v26  ;;  %4072 = vmatpush3.bf16.msra.mxu0 %v4485_v27 }
 0x153   : > { %4049 = vmatprep.subr.bf16.mxu1 %v4654_v9  ;;  %4073 = vmatprep.subr.bf16.mxu0 %v4654_v9 }
 0x154   : > { %4051 = vmatprep.mubr.msk.bf16.mxu1 %vm4655_vm1, %v4654_v9  ;;  %4075 = vmatprep.mubr.msk.bf16.mxu0 %vm4655_vm1, %v4654_v9 }
 0x156   : > { %4050 = vmatpush3.bf16.msra.mxu1 %v4486_v29  ;;  %4074 = vmatpush3.bf16.msra.mxu0 %v4487_v30 }
 0x157   : > { %4063 = vmatprep.subr.bf16.mxu1 %v4654_v9  ;;  %4087 = vmatprep.subr.bf16.mxu0 %v4654_v9 }
 0x159   : > { %4052 = vmatmul.mubr.msk.bf16.vlgmr.msra.gmra.mxu1 %vm418_vm0, %v4825_v28  ;;  %4076 = vmatmul.mubr.msk.bf16.vlgmr.msra.gmra.mxu0 %vm418_vm0, %v4825_v28 }
 0x15a   : > { %4064 = vmatpush3.bf16.msra.mxu1 %v4488_v31  ;;  %4088 = vmatpush3.bf16.msra.mxu0 %v4489_v32 }
 0x15b   : > { %4065 = vmatprep.subr.bf16.mxu1 %v4654_v9  ;;  %4089 = vmatprep.subr.bf16.mxu0 %v4654_v9 }
 0x15c   : > { %4067 = vmatprep.mubr.msk.bf16.mxu1 %vm4655_vm1, %v4654_v9  ;;  %4091 = vmatprep.mubr.msk.bf16.mxu0 %vm4655_vm1, %v4654_v9 }
 0x15e   : > { %4066 = vmatpush3.bf16.msra.mxu1 %v4490_v33  ;;  %4090 = vmatpush3.bf16.msra.mxu0 %v4491_v34 }
 0x15f   : > { %4079 = vmatprep.subr.bf16.mxu1 %v4654_v9  ;;  %4103 = vmatprep.subr.bf16.mxu0 %v4654_v9 }
 0x161   : > { %4068 = vmatmul.mubr.msk.bf16.vlgmr.msra.gmra.mxu1 %vm418_vm0, %v4825_v28  ;;  %4092 = vmatmul.mubr.msk.bf16.vlgmr.msra.gmra.mxu0 %vm418_vm0, %v4825_v28 }
 0x162   : > { %4080 = vmatpush3.bf16.msra.mxu1 %v4492_v35  ;;  %4104 = vmatpush3.bf16.msra.mxu0 %v4493_v36 }
 0x163   : > { %4081 = vmatprep.subr.bf16.mxu1 %v4654_v9  ;;  %4105 = vmatprep.subr.bf16.mxu0 %v4654_v9 }
 0x164   : > { %4083 = vmatprep.mubr.msk.bf16.mxu1 %vm4655_vm1, %v4654_v9  ;;  %4107 = vmatprep.mubr.msk.bf16.mxu0 %vm4655_vm1, %v4654_v9 }
 0x166   : > { %4082 = vmatpush3.bf16.msra.mxu1 %v4494_v37  ;;  %4106 = vmatpush3.bf16.msra.mxu0 %v4495_v38 }
 0x167   : > { %4095 = vmatprep.subr.bf16.mxu1 %v4654_v9  ;;  %4119 = vmatprep.subr.bf16.mxu0 %v4654_v9 }
 0x169   : > { %4084 = vmatmul.mubr.msk.bf16.vlgmr.msra.gmra.mxu1 %vm418_vm0, %v4825_v28  ;;  %4108 = vmatmul.mubr.msk.bf16.vlgmr.msra.gmra.mxu0 %vm418_vm0, %v4825_v28 }
 0x16a   : > { %4096 = vmatpush3.bf16.msra.mxu1 %v4496_v39  ;;  %4120 = vmatpush3.bf16.msra.mxu0 %v4497_v40 }
 0x16b   : > { %4097 = vmatprep.subr.bf16.mxu1 %v4654_v9  ;;  %4121 = vmatprep.subr.bf16.mxu0 %v4654_v9 }
 0x16c   : > { %4099 = vmatprep.mubr.msk.bf16.mxu1 %vm4655_vm1, %v4654_v9  ;;  %4123 = vmatprep.mubr.msk.bf16.mxu0 %vm4655_vm1, %v4654_v9 }
 0x16e   : > { %4098 = vmatpush3.bf16.msra.mxu1 %v4498_v41  ;;  %4122 = vmatpush3.bf16.msra.mxu0 %v4499_v42 }
 0x16f   : > { %4111 = vmatprep.subr.bf16.mxu1 %v4654_v9  ;;  %4135 = vmatprep.subr.bf16.mxu0 %v4654_v9 }
 0x171   : > { %4100 = vmatmul.mubr.msk.bf16.vlgmr.msra.gmra.mxu1 %vm418_vm0, %v4825_v28  ;;  %4124 = vmatmul.mubr.msk.bf16.vlgmr.msra.gmra.mxu0 %vm418_vm0, %v4825_v28 }
 0x172   : > { %4112 = vmatpush3.bf16.msra.mxu1 %v4500_v43  ;;  %4115 = vmatprep.mubr.msk.bf16.mxu1 %vm4655_vm1, %v4654_v9 }
 0x173   : > { %4113 = vmatprep.subr.bf16.mxu1 %v4654_v9  ;;  %4137 = vmatprep.mubr.msk.bf16.mxu0 %vm4655_vm1, %v4654_v9 }
 0x176   : > { %4114 = vmatpush3.bf16.msra.mxu1 %v4501_v44 }
 0x177   : > { %4127 = vmatprep.subr.bf16.mxu1 %v4654_v9 }
 0x179   : > { %4116 = vmatmul.mubr.msk.bf16.vlgmr.msra.gmra.mxu1 %vm418_vm0, %v4825_v28 }
 0x17a   : > { %4128 = vmatpush3.bf16.msra.mxu1 %v4502_v45  ;;  %4131 = vmatprep.mubr.msk.bf16.mxu1 %vm4655_vm1, %v4654_v9 }
 0x17b   : > { %4129 = vmatprep.subr.bf16.mxu1 %v4654_v9 }
 0x17e   : > { %4130 = vmatpush3.bf16.msra.mxu1 %v4503_v46 }
 0x17f   : > { %4141 = vmatprep.subr.bf16.mxu1 %v4654_v9 }
 0x181   : > { %4132 = vmatmul.mubr.msk.bf16.vlgmr.msra.gmra.mxu1 %vm418_vm0, %v4825_v28 }
 0x182   : > { %4143 = vmatprep.mubr.msk.bf16.mxu1 %vm4655_vm1, %v4654_v9 }
 0x211   : > { %v509_v47 = vpop.f32.mrf.mxu1  ;;  %v613_v48 = vpop.f32.mrf.mxu0 }
 0x212   : > { %v671_v63 = vmul.f32 0.35355338, %v509_v47  ;;  %v673_v13 = vmul.f32 0.35355338, %v613_v48 }
 0x213   : > { %v4045_v49 = vpop.f32.mrf.mxu1  ;;  %v4061_v50 = vpop.f32.mrf.mxu0 }
 0x214   : > { %v1123_v5 = vpack.c.bf16 %v671_v63, %v671_v63  ;;  %v1125_v23 = vpack.c.bf16 %v673_v13, %v673_v13 }
 0x215   : > { %v512_v51 = vpop.f32.mrf.mxu1  ;;  %v616_v52 = vpop.f32.mrf.mxu0 }
 0x217   : > { %v4046_v53 = vpop.f32.mrf.mxu1  ;;  %v4062_v54 = vpop.f32.mrf.mxu0 }
 0x219   : > { %v561_v55 = vpop.f32.mrf.mxu1  ;;  %v737_v56 = vpop.f32.mrf.mxu0 }
 0x21a   : > { %v1127_v57 = vpack.c.bf16 %v737_v56, %v737_v56  ;;  %v672_v32 = vmul.f32 0.35355338, %v561_v55 }
 0x21b   : > { %v4053_v58 = vpop.f32.mrf.mxu1  ;;  %v4077_v59 = vpop.f32.mrf.mxu0 }
 0x21c   : > { %v1136_v60 = vsel %vm1131_vm2, %v1127_v57, 0  ;;  %v1124_v37 = vpack.c.bf16 %v672_v32, %v672_v32  ;;  %v414_v58 = vand.u32 127, %v411_v15 }
 0x21d   : > { %v564_v61 = vpop.f32.mrf.mxu1  ;;  %v740_v62 = vpop.f32.mrf.mxu0  ;;  %4136 = vmatpush3.bf16.xpose.msra.mxu0 %v1136_v60 }
 0x21e   : > { %4147 = vmatprep.subr.bf16.mxu0 %v4654_v9  ;;  %vm4979_vm4 = vcmp.le.s32.totalorder %v414_v58, %v4804_v16 }
 0x21f   : > { %v4054_v1 = vpop.f32.mrf.mxu1  ;;  %v4078_v2 = vpop.f32.mrf.mxu0 }
 0x221   : > { %v665_v3 = vpop.f32.mrf.mxu1  ;;  %v841_v4 = vpop.f32.mrf.mxu0 }
 0x222   : > { %v1129_v6 = vpack.c.bf16 %v841_v4, %v841_v4  ;;  %v674_v44 = vmul.f32 0.35355338, %v665_v3 }
 0x223   : > { %v4069_v7 = vpop.f32.mrf.mxu1  ;;  %v4093_v8 = vpop.f32.mrf.mxu0 }
 0x224   : > { %v1228_v10 = vsel %vm1131_vm2, %v1129_v6, 0  ;;  %4138 = vmatmul.mubr.msk.bf16.vlgmr.msra.gmra.mxu0 %vm1131_vm2, %v1123_v5  ;;  %v1126_v48 = vpack.c.bf16 %v674_v44, %v674_v44 }
 0x225   : > { %v668_v11 = vpop.f32.mrf.mxu1  ;;  %v844_v12 = vpop.f32.mrf.mxu0  ;;  %4148 = vmatpush3.bf16.xpose.msra.mxu0 %v1228_v10  ;;  %4149 = vmatprep.mubr.msk.bf16.mxu0 %vm4655_vm1, %v4654_v9 }
 0x226   : > { %4159 = vmatprep.subr.bf16.mxu0 %v4654_v9 }
 0x227   : > { %v4070_v14 = vpop.f32.mrf.mxu1  ;;  %v4094_v20 = vpop.f32.mrf.mxu0 }
 0x229   : > { %v789_v21 = vpop.f32.mrf.mxu1  ;;  %v961_v22 = vpop.f32.mrf.mxu0 }
 0x22a   : > { %v1128_v24 = vpack.c.bf16 %v789_v21, %v789_v21  ;;  %v1370_v25 = vpack.c.bf16 %v961_v22, %v961_v22 }
 0x22b   : > { %v4085_v26 = vpop.f32.mrf.mxu1  ;;  %v4109_v27 = vpop.f32.mrf.mxu0 }
 0x22c   : > { %v1182_v28 = vsel %vm1131_vm2, %v1128_v24, 0  ;;  %v1379_v29 = vsel %vm1377_vm3, %v1370_v25, 0  ;;  %4150 = vmatmul.mubr.msk.bf16.vlgmr.msra.gmra.mxu0 %vm1131_vm2, %v1125_v23 }
 0x22d   : > { %v792_v30 = vpop.f32.mrf.mxu1  ;;  %v964_v31 = vpop.f32.mrf.mxu0  ;;  %4142 = vmatpush3.bf16.xpose.msra.mxu1 %v1182_v28  ;;  %4160 = vmatpush3.bf16.msra.mxu0 %v1379_v29 }
 0x22e   : > { %4153 = vmatprep.subr.bf16.mxu1 %v4654_v9  ;;  %4161 = vmatprep.mubr.msk.bf16.mxu0 %vm4655_vm1, %v4654_v9 }
 0x22f   : > { %v4086_v33 = vpop.f32.mrf.mxu1  ;;  %v4110_v34 = vpop.f32.mrf.mxu0  ;;  %4171 = vmatprep.subr.bf16.mxu0 %v4654_v9 }
 0x231   : > { %v893_v35 = vpop.f32.mrf.mxu1  ;;  %v4963_v36 = vpop.f32.mrf.mxu0 }
 0x232   : > { %v1130_v38 = vpack.c.bf16 %v893_v35, %v893_v35 }
 0x233   : > { %v4101_v39 = vpop.f32.mrf.mxu1  ;;  %v4125_v40 = vpop.f32.mrf.mxu0 }
 0x234   : > { %v1274_v41 = vsel %vm1131_vm2, %v1130_v38, 0  ;;  %4144 = vmatmul.mubr.msk.bf16.vlgmr.msra.gmra.mxu1 %vm1131_vm2, %v1124_v37 }
 0x235   : > { %v896_v42 = vpop.f32.mrf.mxu1  ;;  %v1068_v43 = vpop.f32.mrf.mxu0  ;;  %4154 = vmatpush3.bf16.xpose.msra.mxu1 %v1274_v41  ;;  %4155 = vmatprep.mubr.msk.bf16.mxu1 %vm4655_vm1, %v4654_v9 }
 0x236   : > { %4165 = vmatprep.subr.bf16.mxu1 %v4654_v9 }
 0x237   : > { %v4102_v45 = vpop.f32.mrf.mxu1  ;;  %v4126_v46 = vpop.f32.mrf.mxu0 }
 0x239   : > { %v1013_v47 = vpop.f32.mrf.mxu1 }
 0x23a   : > { %v1371_v49 = vpack.c.bf16 %v1013_v47, %v1013_v47 }
 0x23b   : > { %v4117_v50 = vpop.f32.mrf.mxu1 }
 0x23c   : > { %v1425_v51 = vsel %vm1377_vm3, %v1371_v49, 0  ;;  %4156 = vmatmul.mubr.msk.bf16.vlgmr.msra.gmra.mxu1 %vm1131_vm2, %v1126_v48  ;;  %v1372_v50 = vpack.c.bf16 %v4963_v36, %v4963_v36 }
 0x23d   : > { %v1016_v52 = vpop.f32.mrf.mxu1  ;;  %4166 = vmatpush3.bf16.msra.mxu1 %v1425_v51  ;;  %4167 = vmatprep.mubr.msk.bf16.mxu1 %vm4655_vm1, %v4654_v9 }
 0x23e   : > { %4177 = vmatprep.subr.bf16.mxu1 %v4654_v9 }
 0x23f   : > { %v4118_v53 = vpop.f32.mrf.mxu1 }
 0x241   : > { %v4975_v54 = vpop.f32.mrf.mxu1 }
 0x243   : > { %v4133_v55 = vpop.f32.mrf.mxu1 }
 0x244   : > { %v1471_v55 = vsel %vm1377_vm3, %v1372_v50, 0 }
 0x245   : > { %v1120_v56 = vpop.f32.mrf.mxu1 }
 0x247   : > { %v4134_v57 = vpop.f32.mrf.mxu1 }
 0x2e4   : > { %v1172_v60 = vpop.f32.mrf.mxu0 }
 0x2e5   : > { %v1318_v61 = vsel %vm4979_vm4, %v1172_v60, -1e+30 }
 0x2e6   : > { %v4139_v62 = vpop.f32.mrf.mxu0  ;;  %v1322_v63 = vsel %vm1131_vm2, %v1318_v61, -inf }
 0x2e7   : > { %1323 = vmax.xlane.f32.xlu1 %v1322_v63 }
 0x2e8   : > { %v1175_v1 = vpop.f32.mrf.mxu0 }
 0x2ea   : > { %v4140_v2 = vpop.f32.mrf.mxu0 }
 0x2ec   : > { %v1264_v3 = vpop.f32.mrf.mxu0 }
 0x2ed   : > { %v1320_v4 = vsel %vm4979_vm4, %v1264_v3, -1e+30 }
 0x2ee   : > { %v4151_v15 = vpop.f32.mrf.mxu0  ;;  %v1328_v5 = vsel %vm1131_vm2, %v1320_v4, -inf }
 0x2ef   : > { %1329 = vmax.xlane.f32.xlu0 %v1328_v5  ;;  %v1564_v5 = vld [vmem:[%s5519_s4 + $0x4] sm:$0xf] }
 0x2f0   : > { %v1267_v6 = vpop.f32.mrf.mxu0 }
 0x2f1   : > { %v1617_v6 = vsel %vm1377_vm3, %v1564_v5, 0 }
 0x2f2   : > { %v4152_v7 = vpop.f32.mrf.mxu0 }
 0x2f3   : > { %v1565_v7 = vld [vmem:[%s5519_s4 + $0x8] sm:$0xf] }
 0x2f4   : > { %v1218_v8 = vpop.f32.mrf.mxu1 }
 0x2f5   : > { %v1319_v10 = vsel %vm4979_vm4, %v1218_v8, -1e+30 }
 0x2f6   : > { %v4145_v11 = vpop.f32.mrf.mxu1  ;;  %v1325_v12 = vsel %vm1131_vm2, %v1319_v10, -inf }
 0x2f7   : > { %1326 = vmax.xlane.f32.xlu1 %v1325_v12  ;;  %v1663_v11 = vsel %vm1377_vm3, %v1565_v7, 0  ;;  %v4505_v7 = vld [vmem:[%s5520_s5] sm:$0xff]  }
 0x2f8   : > { %v1221_v13 = vpop.f32.mrf.mxu1 }
 0x2fa   : > { %v4146_v14 = vpop.f32.mrf.mxu1 }
 0x2fc   : > { %v1310_v20 = vpop.f32.mrf.mxu1 }
 0x2fd   : > { %v1321_v21 = vsel %vm4979_vm4, %v1310_v20, -1e+30 }
 0x2fe   : > { %v4157_v22 = vpop.f32.mrf.mxu1  ;;  %v1331_v23 = vsel %vm1131_vm2, %v1321_v21, -inf }
 0x2ff   : > { %1332 = vmax.xlane.f32.xlu1 %v1331_v23 }
 0x300   : > { %v1313_v24 = vpop.f32.mrf.mxu1 }
 0x302   : > { %v4158_v25 = vpop.f32.mrf.mxu1 }
 0x303   : > { %v1566_v25 = vld [vmem:[%s5519_s4 + $0xc] sm:$0xf] }
 0x370   : > { %v1324_v26 = vpop.xlane.xlu1 %1323 }
 0x371   : > { %v1334_v27 = vsub.f32 %v1318_v61, %v1324_v26  ;;  %v1373_v61 = vpack.c.bf16 %v4975_v54, %v4975_v54  ;;  %v1563_v54 = vld [vmem:[%s5519_s4] sm:$0xf] }
 0x372   : > { %v1571_v15 = vsel %vm1377_vm3, %v1563_v54, 0 }
 0x373   : > { %v1338_v28 = vmul.f32 1.442695, %v1334_v27  ;;  %v1517_v1 = vsel %vm1377_vm3, %v1373_v61, 0 }
 0x375   : > { %4552 = vpow2.f32 %v1338_v28  ;;  %v1709_v28 = vsel %vm1377_vm3, %v1566_v25, 0 }
 0x378   : > { %v1330_v29 = vpop.xlane.xlu0 %1329 }
 0x379   : > { %v1336_v30 = vsub.f32 %v1320_v4, %v1330_v29 }
 0x37b   : > { %v1342_v31 = vmul.f32 1.442695, %v1336_v30 }
 0x37d   : > { %4554 = vpow2.f32 %v1342_v31 }
 0x380   : > { %v1327_v32 = vpop.xlane.xlu1 %1326 }
 0x381   : > { %v1335_v33 = vsub.f32 %v1319_v10, %v1327_v32 }
 0x382   : > { %v4553_v34 = vpop.eup %4552 }
 0x383   : > { %v1340_v35 = vmul.f32 1.442695, %v1335_v33  ;;  %v1346_v37 = vsel %vm1131_vm2, %v4553_v34, 0.0 }
 0x384   : > { %1347 = vadd.xlane.f32.xlu0 %v1346_v37 }
 0x385   : > { %4556 = vpow2.f32 %v1340_v35 }
 0x388   : > { %v1333_v38 = vpop.xlane.xlu1 %1332 }
 0x389   : > { %v1337_v39 = vsub.f32 %v1321_v21, %v1333_v38 }
 0x38a   : > { %v4555_v40 = vpop.eup %4554 }
 0x38b   : > { %v1344_v41 = vmul.f32 1.442695, %v1337_v39  ;;  %v1352_v42 = vsel %vm1131_vm2, %v4555_v40, 0.0 }
 0x38c   : > { %1353 = vadd.xlane.f32.xlu0 %v1352_v42 }
 0x38d   : > { %4558 = vpow2.f32 %v1344_v41 }
 0x392   : > { %v4557_v43 = vpop.eup %4556 }
 0x393   : > { %v1349_v44 = vsel %vm1131_vm2, %v4557_v43, 0.0 }
 0x394   : > { %1350 = vadd.xlane.f32.xlu1 %v1349_v44 }
 0x39a   : > { %v4559_v45 = vpop.eup %4558 }
 0x39b   : > { %v1355_v46 = vsel %vm1131_vm2, %v4559_v45, 0.0 }
 0x39c   : > { %1356 = vadd.xlane.f32.xlu1 %v1355_v46 }
 0x40d   : > { %v1348_v47 = vpop.xlane.xlu0 %1347 }
 0x40e   : > { %4560 = vrcp.f32 %v1348_v47 }
 0x415   : > { %v1354_v48 = vpop.xlane.xlu0 %1353 }
 0x416   : > { %4562 = vrcp.f32 %v1354_v48 }
 0x41b   : > { %v4561_v49 = vpop.eup %4560 }
 0x41c   : > { %v1362_v51 = vmul.f32 %v4561_v49, %v4553_v34 }
 0x41d   : > { %v1351_v52 = vpop.xlane.xlu1 %1350 }
 0x41e   : > { %4564 = vrcp.f32 %v1351_v52  ;;  %v1366_v53 = vpack.c.bf16 %v1362_v51, %v1362_v51 }
 0x420   : > { %4162 = vmatmul.mubr.msk.bf16.vlgmr.msra.gmra.mxu0 %vm1131_vm2, %v1366_v53  ;;  %v1761_v53 = vsub.s32 4, %v4804_v16 }
 0x421   : > { %4172 = vmatpush3.bf16.msra.mxu0 %v1471_v55  ;;  %4173 = vmatprep.mubr.msk.bf16.mxu0 %vm4655_vm1, %v4654_v9 }
 0x422   : > { %4183 = vmatprep.subr.bf16.mxu0 %v4654_v9  ;;  %v1762_v61 = vrot.slane %v4810_v18, %v1761_v53 }
 0x423   : > { %v4563_v56 = vpop.eup %4562 }
 0x424   : > { %v1364_v57 = vmul.f32 %v4563_v56, %v4555_v40 }
 0x425   : > { %v1357_v58 = vpop.xlane.xlu1 %1356 }
 0x426   : > { %4566 = vrcp.f32 %v1357_v58  ;;  %v1368_v60 = vpack.c.bf16 %v1364_v57, %v1364_v57 }
 0x428   : > { %4174 = vmatmul.mubr.msk.bf16.vlgmr.msra.gmra.mxu0 %vm1131_vm2, %v1368_v60 }
 0x429   : > { %4185 = vmatprep.mubr.msk.bf16.mxu0 %vm4655_vm1, %v4654_v9  ;;  %4184 = vmatpush3.bf16.msra.mxu0 %v1571_v15 }
 0x42a   : > { %4195 = vmatprep.subr.bf16.mxu0 %v4654_v9 }
 0x42b   : > { %v4565_v36 = vpop.eup %4564 }
 0x42c   : > { %v1363_v62 = vmul.f32 %v4565_v36, %v4557_v43 }
 0x42e   : > { %v1367_v63 = vpack.c.bf16 %v1363_v62, %v1363_v62 }
 0x430   : > { %4168 = vmatmul.mubr.msk.bf16.vlgmr.msra.gmra.mxu1 %vm1131_vm2, %v1367_v63 }
 0x431   : > { %4178 = vmatpush3.bf16.msra.mxu1 %v1517_v1  ;;  %4179 = vmatprep.mubr.msk.bf16.mxu1 %vm4655_vm1, %v4654_v9 }
 0x432   : > { %4189 = vmatprep.subr.bf16.mxu1 %v4654_v9 }
 0x433   : > { %v4567_v2 = vpop.eup %4566 }
 0x434   : > { %v1365_v3 = vmul.f32 %v4567_v2, %v4559_v45 }
 0x436   : > { %v1369_v4 = vpack.c.bf16 %v1365_v3, %v1365_v3 }
 0x438   : > { %4180 = vmatmul.mubr.msk.bf16.vlgmr.msra.gmra.mxu1 %vm1131_vm2, %v1369_v4 }
 0x439   : > { %4191 = vmatprep.mubr.msk.bf16.mxu1 %vm4655_vm1, %v4654_v9  ;;  %4190 = vmatpush3.bf16.msra.mxu1 %v1617_v6 }
 0x43a   : > { %4201 = vmatprep.subr.bf16.mxu1 %v4654_v9 }
 0x4e0   : > { %v1415_v8 = vpop.f32.mrf.mxu0 }
 0x4e1   : > { %v1559_v10 = vpack.c.bf16 %v1415_v8, %v1415_v8  ;;  %v4506_v8 = vld [vmem:[%s5521_s6 + $0x38] sm:$0xff]  }
 0x4e2   : > { %v4163_v12 = vpop.f32.mrf.mxu0 }
 0x4e3   : > { %4186 = vmatmul.mubr.msk.bf16.vlgmr.msra.gmra.mxu0 %vm1131_vm2, %v1559_v10  ;;  %v4507_v10 = vld [vmem:[%s5521_s6 + $0x30] sm:$0xff]   ;;  %v4509_v12 = vld [vmem:[%s5521_s6 + $0x20] sm:$0xff]  }
 0x4e4   : > { %v1418_v13 = vpop.f32.mrf.mxu0  ;;  %4196 = vmatpush3.bf16.msra.mxu0 %v1663_v11  ;;  %4197 = vmatprep.mubr.msk.bf16.mxu0 %vm4655_vm1, %v4654_v9  ;;  %v4508_v11 = vld [vmem:[%s5521_s6 + $0x28] sm:$0xff]  }
 0x4e5   : > { %4207 = vmatprep.subr.bf16.mxu0 %v4654_v9  ;;  %v4510_v13 = vld [vmem:[%s5521_s6 + $0x18] sm:$0xff]  }
 0x4e6   : > { %v4164_v14 = vpop.f32.mrf.mxu0 }
 0x4e7   : > { %v4511_v14 = vld [vmem:[%s5521_s6 + $0x10] sm:$0xff]  }
 0x4e8   : > { %v1507_v20 = vpop.f32.mrf.mxu0 }
 0x4e9   : > { %v1561_v21 = vpack.c.bf16 %v1507_v20, %v1507_v20 }
 0x4ea   : > { %v4175_v22 = vpop.f32.mrf.mxu0 }
 0x4eb   : > { %4198 = vmatmul.mubr.msk.bf16.vlgmr.msra.gmra.mxu0 %vm1131_vm2, %v1561_v21 }
 0x4ec   : > { %v1510_v23 = vpop.f32.mrf.mxu0  ;;  %4211 = vmatprep.mubr.msk.bf16.mxu0 %vm4655_vm1, %v4654_v9 }
 0x4ed   : > { %v1779_v23 = vsub.s32 2, %v4804_v16 }
 0x4ee   : > { %v4176_v24 = vpop.f32.mrf.mxu0 }
 0x4ef   : > { %v1784_v24 = vsub.s32 3, %v4804_v16  ;;  %v1780_v25 = vrot.slane %v4810_v18, %v1779_v23 }
 0x4f0   : > { %v1461_v26 = vpop.f32.mrf.mxu1 }
 0x4f1   : > { %v1560_v27 = vpack.c.bf16 %v1461_v26, %v1461_v26 }
 0x4f2   : > { %v4169_v29 = vpop.f32.mrf.mxu1 }
 0x4f3   : > { %4192 = vmatmul.mubr.msk.bf16.vlgmr.msra.gmra.mxu1 %vm1131_vm2, %v1560_v27 }
 0x4f4   : > { %v1464_v30 = vpop.f32.mrf.mxu1  ;;  %4202 = vmatpush3.bf16.msra.mxu1 %v1709_v28  ;;  %4203 = vmatprep.mubr.msk.bf16.mxu1 %vm4655_vm1, %v4654_v9  ;;  %v1785_v28 = vrot.slane %v4810_v18, %v1784_v24 }
 0x4f5   : > { %4215 = vmatprep.subr.bf16.mxu1 %v4654_v9 }
 0x4f6   : > { %v4170_v31 = vpop.f32.mrf.mxu1 }
 0x4f8   : > { %v1553_v32 = vpop.f32.mrf.mxu1 }
 0x4f9   : > { %v1562_v33 = vpack.c.bf16 %v1553_v32, %v1553_v32  ;;  %v4512_v32 = vld [vmem:[%s5521_s6 + $0x8] sm:$0xff]  }
 0x4fa   : > { %v4181_v34 = vpop.f32.mrf.mxu1 }
 0x4fb   : > { %4204 = vmatmul.mubr.msk.bf16.vlgmr.msra.gmra.mxu1 %vm1131_vm2, %v1562_v33  ;;  %v4513_v33 = vld [vmem:[%s5521_s6] sm:$0xff]  }
 0x4fc   : > { %v1556_v35 = vpop.f32.mrf.mxu1  ;;  %4231 = vmatprep.mubr.msk.bf16.mxu1 %vm4655_vm1, %v4654_v9  ;;  %4216 = vmatpush3.bf16.msra.mxu1 %v4506_v8  ;;  %v3736_v34 = vld [vmem:[%s5523_s8] ss:$0 sm:$0xff] }
 0x4fd   : > { %4217 = vmatprep.subr.bf16.mxu1 %v4654_v9 }
 0x4fe   : > { %v4182_v37 = vpop.f32.mrf.mxu1 }
 0x500   : > { %4218 = vmatpush3.bf16.msra.mxu1 %v4507_v10  ;;  %v4522_v10 = vld [vmem:[%s5533_s1 + $0x68] sm:$0xff]  }
 0x501   : > { %4219 = vmatprep.subr.bf16.mxu1 %v4654_v9 }
 0x504   : > { %4220 = vmatpush3.bf16.msra.mxu1 %v4508_v11  ;;  %v4523_v11 = vld [vmem:[%s5518_s3 + $0x48] sm:$0xff]  }
 0x505   : > { %4221 = vmatprep.subr.bf16.mxu1 %v4654_v9 }
 0x508   : > { %4222 = vmatpush3.bf16.msra.mxu1 %v4509_v12  ;;  %v4524_v12 = vld [vmem:[%s5533_s1 + $0x60] sm:$0xff]  }
 0x509   : > { %4223 = vmatprep.subr.bf16.mxu1 %v4654_v9 }
 0x50c   : > { %4224 = vmatpush3.bf16.msra.mxu1 %v4510_v13  ;;  %v4525_v13 = vld [vmem:[%s5518_s3 + $0x40] sm:$0xff]  }
 0x50d   : > { %4225 = vmatprep.subr.bf16.mxu1 %v4654_v9 }
 0x510   : > { %4226 = vmatpush3.bf16.msra.mxu1 %v4511_v14  ;;  %v4526_v14 = vld [vmem:[%s5533_s1 + $0x78] sm:$0xff]  }
 0x511   : > { %4227 = vmatprep.subr.bf16.mxu1 %v4654_v9 }
 0x514   : > { %4228 = vmatpush3.bf16.msra.mxu1 %v4512_v32  ;;  %v4537_v32 = vld [vmem:[%s5518_s3 + $0x70] sm:$0xff]  }
 0x515   : > { %4229 = vmatprep.subr.bf16.mxu1 %v4654_v9 }
 0x518   : > { %4230 = vmatpush3.bf16.msra.mxu1 %v4513_v33 }
 0x519   : > { %4267 = vmatprep.subr.bf16.mxu1 %v4654_v9 }
 0x5a3   : > { %v1607_v38 = vpop.f32.mrf.mxu0 }
 0x5a4   : > { %v1751_v49 = vsel %vm418_vm0, %v1607_v38, 0.0 }
 0x5a5   : > { %v4187_v39 = vpop.f32.mrf.mxu0 }
 0x5a7   : > { %v1610_v40 = vpop.f32.mrf.mxu0 }
 0x5a9   : > { %v4188_v41 = vpop.f32.mrf.mxu0 }
 0x5ab   : > { %v1699_v42 = vpop.f32.mrf.mxu0 }
 0x5ac   : > { %v1754_v55 = vsel %vm418_vm0, %v1699_v42, 0.0 }
 0x5ad   : > { %v4199_v43 = vpop.f32.mrf.mxu0 }
 0x5ae   : > { %v1962_v43 = vsub.s32 5, %v4804_v16  ;;  %v4548_v16 = vld [vmem:[%s5525_s10 + $0x8] sm:$0xff]  }
 0x5af   : > { %v1702_v44 = vpop.f32.mrf.mxu0 }
 0x5b0   : > { %v1963_v44 = vrot.slane %v4810_v18, %v1962_v43  ;;  %v4514_v18 = vld [vmem:[%s5533_s1 + $0x48] sm:$0xff]  }
 0x5b1   : > { %v4200_v45 = vpop.f32.mrf.mxu0 }
 0x5b3   : > { %v1653_v46 = vpop.f32.mrf.mxu1 }
 0x5b4   : > { %v1752_v47 = vsel %vm418_vm0, %v1653_v46, 0.0 }
 0x5b5   : > { %v4193_v48 = vpop.f32.mrf.mxu1  ;;  %v1753_v50 = vadd.f32 %v1752_v47, %v1751_v49 }
 0x5b7   : > { %v1656_v51 = vpop.f32.mrf.mxu1  ;;  %v1755_v57 = vadd.f32 %v1754_v55, %v1753_v50 }
 0x5b9   : > { %v4194_v52 = vpop.f32.mrf.mxu1 }
 0x5bb   : > { %v1745_v56 = vpop.f32.mrf.mxu1 }
 0x5bc   : > { %v1756_v58 = vsel %vm418_vm0, %v1745_v56, 0.0 }
 0x5bd   : > { %v1757_v60 = vadd.f32 %v1756_v58, %v1755_v57  ;;  %v4205_v36 = vpop.f32.mrf.mxu1 }
 0x5be   : > { %v4516_v36 = vld [vmem:[%s5533_s1 + $0x40] sm:$0xff]  }
 0x5bf   : > { %v1758_v62 = vadd.f32 %v1757_v60, %v4775_v0  ;;  %v1748_v63 = vpop.f32.mrf.mxu1  ;;  %v4504_v0 = vld [vmem:[%s5520_s5 + $0x8] sm:$0xff]  }
 0x5c0   : > { %4208 = vmatpush3.bf16.msra.mxu0 %v4504_v0  ;;  %v4515_v60 = vld [vmem:[%s5517_s2 + $0x48] sm:$0xff]   ;;  %v4518_v0 = vld [vmem:[%s5533_s1 + $0x58] sm:$0xff]  }
 0x5c1   : > { %v4206_v1 = vpop.f32.mrf.mxu1  ;;  %v5060_v2 = vadd.f32 %v1762_v61, %v1758_v62  ;;  %4209 = vmatprep.subr.bf16.mxu0 %v4654_v9  ;;  %v4517_v61 = vld [vmem:[%s5517_s2 + $0x40] sm:$0xff]  }
 0x5c3   : > { %v1764_v3 = vsel %vm418_vm0, %v5060_v2, 0.0 }
 0x5c4   : > { %1765 = vadd.xlane.f32.xlu0 %v1764_v3  ;;  %4210 = vmatpush3.bf16.msra.mxu0 %v4505_v7  ;;  %v4519_v7 = vld [vmem:[%s5517_s2 + $0x68] sm:$0xff]  }
 0x5c5   : > { %4235 = vmatprep.subr.bf16.mxu0 %v4654_v9 }
 0x64d   : > { %v1766_v4 = vpop.xlane.xlu0 %1765 }
 0x64e   : > { %v1767_v54 = vmul.f32 0.03125, %v1766_v4 }
 0x650   : > { %v1768_v15 = vsub.f32 %v5060_v2, %v1767_v54 }
 0x652   : > { %v1769_v5 = vmul.f32 %v1768_v15, %v1768_v15 }
 0x654   : > { %v1770_v6 = vsel %vm418_vm0, %v1769_v5, 0.0 }
 0x655   : > { %1771 = vadd.xlane.f32.xlu1 %v1770_v6 }
 0x6de   : > { %v1772_v20 = vpop.xlane.xlu1 %1771 }
 0x6df   : > { %v1773_v21 = vmul.f32 0.03125, %v1772_v20  ;;  %v4527_v20 = vld [vmem:[%s5518_s3 + $0x68] sm:$0xff]  }
 0x6e1   : > { %v1774_v22 = vadd.f32 1e-05, %v1773_v21  ;;  %v4528_v21 = vld [vmem:[%s5533_s1 + $0x70] sm:$0xff]  }
 0x6e3   : > { %4568 = vrsqrt.f32 %v1774_v22  ;;  %v4529_v22 = vld [vmem:[%s5518_s3 + $0x60] sm:$0xff]  }
 0x6f0   : > { %v4569_v26 = vpop.eup %4568 }
 0x6f1   : > { %v1776_v27 = vmul.f32 %v4569_v26, %v1768_v15  ;;  %v4531_v26 = vld [vmem:[%s5517_s2 + $0x50] sm:$0xff]  }
 0x6f3   : > { %v1781_v29 = vmul.f32 %v1780_v25, %v1776_v27  ;;  %v4530_v25 = vld [vmem:[%s5517_s2 + $0x58] sm:$0xff]  }
 0x6f4   : > { %v4532_v27 = vld [vmem:[%s5517_s2 + $0x78] sm:$0xff]  }
 0x6f5   : > { %v1786_v30 = vadd.f32 %v1785_v28, %v1781_v29  ;;  %v4533_v28 = vld [vmem:[%s5517_s2 + $0x70] sm:$0xff]   ;;  %v4534_v29 = vld [vmem:[%s5518_s3 + $0x58] sm:$0xff]  }
 0x6f7   : > { %v1787_v31 = vpack.c.bf16 %v1786_v30, %v1786_v30  ;;  %v4535_v30 = vld [vmem:[%s5518_s3 + $0x50] sm:$0xff]  }
 0x6f9   : > { %4212 = vmatmul.mubr.msk.bf16.vlgmr.msra.gmra.mxu0 %vm418_vm0, %v1787_v31  ;;  %v4536_v31 = vld [vmem:[%s5518_s3 + $0x78] sm:$0xff]  }
 0x6fa   : > { %4239 = vmatprep.mubr.msk.bf16.mxu0 %vm4655_vm1, %v4654_v9  ;;  %4236 = vmatpush3.bf16.msra.mxu0 %v4514_v18 }
 0x6fb   : > { %4237 = vmatprep.subr.bf16.mxu0 %v4654_v9 }
 0x6fe   : > { %4238 = vmatpush3.bf16.msra.mxu0 %v4516_v36 }
 0x6ff   : > { %4243 = vmatprep.subr.bf16.mxu0 %v4654_v9 }
 0x7b9   : > { %v1847_v35 = vpop.f32.mrf.mxu0 }
 0x7ba   : > { %v1848_v37 = vadd.f32 %v3736_v34, %v1847_v35 }
 0x7bb   : > { %v4213_v38 = vpop.f32.mrf.mxu0 }
 0x7bc   : > { %v1853_v39 = vmax.f32 %v1848_v37, 0.0 }
 0x7bd   : > { %v1850_v40 = vpop.f32.mrf.mxu0 }
 0x7be   : > { %v1854_v41 = vpack.c.bf16 %v1853_v39, %v1853_v39 }
 0x7bf   : > { %v4214_v42 = vpop.f32.mrf.mxu0 }
 0x7c0   : > { %4232 = vmatmul.mubr.bf16.vlgmr.msra.gmra.mxu1 %v1854_v41 }
 0x7c1   : > { %4271 = vmatprep.mubr.msk.bf16.mxu1 %vm4655_vm1, %v4654_v9  ;;  %4268 = vmatpush3.bf16.msra.mxu1 %v4515_v60 }
 0x7c2   : > { %4269 = vmatprep.subr.bf16.mxu1 %v4654_v9 }
 0x7c5   : > { %4270 = vmatpush3.bf16.msra.mxu1 %v4517_v61 }
 0x7c6   : > { %4283 = vmatprep.subr.bf16.mxu1 %v4654_v9 }
 0x880   : > { %v1953_v45 = vpop.f32.mrf.mxu1 }
 0x881   : > { %v1959_v46 = vadd.f32 %v1953_v45, %v5060_v2  ;;  %v5152_v2 = vld [vmem:[%s5522_s7 + $0x8] sm:$0xff] }
 0x882   : > { %v4233_v47 = vpop.f32.mrf.mxu1  ;;  %v1985_v3 = vrot.slane %v5152_v2, %v435_v17  ;;  %v1990_v54 = vrot.slane %v5152_v2, %v440_v19  ;;  %v4520_v17 = vld [vmem:[%s5533_s1 + $0x50] sm:$0xff]   ;;  %v4521_v19 = vld [vmem:[%s5517_s2 + $0x60] sm:$0xff]  }
 0x883   : > { %v5127_v48 = vadd.f32 %v1963_v44, %v1959_v46 }
 0x884   : > { %v1956_v49 = vpop.f32.mrf.mxu1 }
 0x885   : > { %v1969_v50 = vsel %vm418_vm0, %v5127_v48, 0.0 }
 0x886   : > { %1970 = vadd.xlane.f32.xlu0 %v1969_v50  ;;  %v4234_v51 = vpop.f32.mrf.mxu1 }
 0x90f   : > { %v1971_v52 = vpop.xlane.xlu0 %1970 }
 0x910   : > { %v1972_v55 = vmul.f32 0.03125, %v1971_v52 }
 0x912   : > { %v1973_v56 = vsub.f32 %v5127_v48, %v1972_v55 }
 0x914   : > { %v1974_v57 = vmul.f32 %v1973_v56, %v1973_v56 }
 0x916   : > { %v1975_v58 = vsel %vm418_vm0, %v1974_v57, 0.0 }
 0x917   : > { %1976 = vadd.xlane.f32.xlu1 %v1975_v58 }
 0x9a0   : > { %v1977_v62 = vpop.xlane.xlu1 %1976 }
 0x9a1   : > { %v1978_v63 = vmul.f32 0.03125, %v1977_v62 }
 0x9a3   : > { %v1979_v1 = vadd.f32 1e-05, %v1978_v63 }
 0x9a5   : > { %4570 = vrsqrt.f32 %v1979_v1 }
 0x9b2   : > { %v4571_v4 = vpop.eup %4570 }
 0x9b3   : > { %v1981_v15 = vmul.f32 %v4571_v4, %v1973_v56 }
 0x9b5   : > { %v1986_v5 = vmul.f32 %v1985_v3, %v1981_v15 }
 0x9b7   : > { %v1991_v6 = vadd.f32 %v1990_v54, %v1986_v5 }
 0x9b9   : > { %v5166_v8 = vpack.c.bf16 %v1991_v6, %v1991_v6 }
 0x9bb   : > { %4240 = vmatmul.mubr.msk.bf16.vlgmr.msra.gmra.mxu0 %vm418_vm0, %v5166_v8  ;;  %4272 = vmatmul.mubr.msk.bf16.vlgmr.msra.gmra.mxu1 %vm418_vm0, %v5166_v8 }
 0x9bc   : > { %4244 = vmatpush3.bf16.msra.mxu0 %v4518_v0  ;;  %4284 = vmatpush3.bf16.msra.mxu1 %v4519_v7 }
 0x9bd   : > { %4245 = vmatprep.subr.bf16.mxu0 %v4654_v9  ;;  %4285 = vmatprep.subr.bf16.mxu1 %v4654_v9 }
 0x9be   : > { %4247 = vmatprep.mubr.msk.bf16.mxu0 %vm4655_vm1, %v4654_v9  ;;  %4287 = vmatprep.mubr.msk.bf16.mxu1 %vm4655_vm1, %v4654_v9 }
 0x9c0   : > { %4246 = vmatpush3.bf16.msra.mxu0 %v4520_v17  ;;  %4286 = vmatpush3.bf16.msra.mxu1 %v4521_v19 }
 0x9c1   : > { %4251 = vmatprep.subr.bf16.mxu0 %v4654_v9  ;;  %4299 = vmatprep.subr.bf16.mxu1 %v4654_v9 }
 0x9c3   : > { %4248 = vmatmul.mubr.msk.bf16.vlgmr.msra.gmra.mxu0 %vm418_vm0, %v5166_v8  ;;  %4288 = vmatmul.mubr.msk.bf16.vlgmr.msra.gmra.mxu1 %vm418_vm0, %v5166_v8 }
 0x9c4   : > { %4252 = vmatpush3.bf16.msra.mxu0 %v4522_v10  ;;  %4300 = vmatpush3.bf16.msra.mxu1 %v4523_v11 }
 0x9c5   : > { %4253 = vmatprep.subr.bf16.mxu0 %v4654_v9  ;;  %4301 = vmatprep.subr.bf16.mxu1 %v4654_v9 }
 0x9c6   : > { %4255 = vmatprep.mubr.msk.bf16.mxu0 %vm4655_vm1, %v4654_v9  ;;  %4303 = vmatprep.mubr.msk.bf16.mxu1 %vm4655_vm1, %v4654_v9 }
 0x9c8   : > { %4254 = vmatpush3.bf16.msra.mxu0 %v4524_v12  ;;  %4302 = vmatpush3.bf16.msra.mxu1 %v4525_v13 }
 0x9c9   : > { %4259 = vmatprep.subr.bf16.mxu0 %v4654_v9  ;;  %4315 = vmatprep.subr.bf16.mxu1 %v4654_v9 }
 0x9cb   : > { %4256 = vmatmul.mubr.msk.bf16.vlgmr.msra.gmra.mxu0 %vm418_vm0, %v5166_v8  ;;  %4304 = vmatmul.mubr.msk.bf16.vlgmr.msra.gmra.mxu1 %vm418_vm0, %v5166_v8 }
 0x9cc   : > { %4260 = vmatpush3.bf16.msra.mxu0 %v4526_v14  ;;  %4316 = vmatpush3.bf16.msra.mxu1 %v4527_v20 }
 0x9cd   : > { %4261 = vmatprep.subr.bf16.mxu0 %v4654_v9  ;;  %4317 = vmatprep.subr.bf16.mxu1 %v4654_v9 }
 0x9ce   : > { %4263 = vmatprep.mubr.msk.bf16.mxu0 %vm4655_vm1, %v4654_v9  ;;  %4319 = vmatprep.mubr.msk.bf16.mxu1 %vm4655_vm1, %v4654_v9 }
 0x9d0   : > { %4262 = vmatpush3.bf16.msra.mxu0 %v4528_v21  ;;  %4318 = vmatpush3.bf16.msra.mxu1 %v4529_v22 }
 0x9d1   : > { %4275 = vmatprep.subr.bf16.mxu0 %v4654_v9  ;;  %4331 = vmatprep.subr.bf16.mxu1 %v4654_v9 }
 0x9d3   : > { %4264 = vmatmul.mubr.msk.bf16.vlgmr.msra.gmra.mxu0 %vm418_vm0, %v5166_v8  ;;  %4320 = vmatmul.mubr.msk.bf16.vlgmr.msra.gmra.mxu1 %vm418_vm0, %v5166_v8 }
 0x9d4   : > { %4276 = vmatpush3.bf16.msra.mxu0 %v4530_v25  ;;  %4279 = vmatprep.mubr.msk.bf16.mxu0 %vm4655_vm1, %v4654_v9 }
 0x9d5   : > { %4277 = vmatprep.subr.bf16.mxu0 %v4654_v9  ;;  %4333 = vmatprep.mubr.msk.bf16.mxu1 %vm4655_vm1, %v4654_v9 }
 0x9d8   : > { %4278 = vmatpush3.bf16.msra.mxu0 %v4531_v26 }
 0x9d9   : > { %4291 = vmatprep.subr.bf16.mxu0 %v4654_v9 }
 0x9db   : > { %4280 = vmatmul.mubr.msk.bf16.vlgmr.msra.gmra.mxu0 %vm418_vm0, %v5166_v8 }
 0x9dc   : > { %4292 = vmatpush3.bf16.msra.mxu0 %v4532_v27  ;;  %4295 = vmatprep.mubr.msk.bf16.mxu0 %vm4655_vm1, %v4654_v9 }
 0x9dd   : > { %4293 = vmatprep.subr.bf16.mxu0 %v4654_v9 }
 0x9e0   : > { %4294 = vmatpush3.bf16.msra.mxu0 %v4533_v28 }
 0x9e1   : > { %4307 = vmatprep.subr.bf16.mxu0 %v4654_v9 }
 0x9e3   : > { %4296 = vmatmul.mubr.msk.bf16.vlgmr.msra.gmra.mxu0 %vm418_vm0, %v5166_v8 }
 0x9e4   : > { %4308 = vmatpush3.bf16.msra.mxu0 %v4534_v29  ;;  %4311 = vmatprep.mubr.msk.bf16.mxu0 %vm4655_vm1, %v4654_v9 }
 0x9e5   : > { %4309 = vmatprep.subr.bf16.mxu0 %v4654_v9 }
 0x9e8   : > { %4310 = vmatpush3.bf16.msra.mxu0 %v4535_v30 }
 0x9e9   : > { %4323 = vmatprep.subr.bf16.mxu0 %v4654_v9 }
 0x9eb   : > { %4312 = vmatmul.mubr.msk.bf16.vlgmr.msra.gmra.mxu0 %vm418_vm0, %v5166_v8 }
 0x9ec   : > { %4324 = vmatpush3.bf16.msra.mxu0 %v4536_v31  ;;  %4327 = vmatprep.mubr.msk.bf16.mxu0 %vm4655_vm1, %v4654_v9 }
 0x9ed   : > { %4325 = vmatprep.subr.bf16.mxu0 %v4654_v9 }
 0x9f0   : > { %4326 = vmatpush3.bf16.msra.mxu0 %v4537_v32 }
 0x9f1   : > { %4337 = vmatprep.subr.bf16.mxu0 %v4654_v9 }
 0x9f3   : > { %4328 = vmatmul.mubr.msk.bf16.vlgmr.msra.gmra.mxu0 %vm418_vm0, %v5166_v8 }
 0x9f4   : > { %4339 = vmatprep.mubr.msk.bf16.mxu0 %vm4655_vm1, %v4654_v9 }
 0xa7b   : > { %v2059_v33 = vpop.f32.mrf.mxu0  ;;  %v2288_v34 = vpop.f32.mrf.mxu1 }
 0xa7c   : > { %v2679_v35 = vpack.c.bf16 %v2288_v34, %v2288_v34  ;;  %v2221_v42 = vmul.f32 0.35355338, %v2059_v33 }
 0xa7d   : > { %v4241_v37 = vpop.f32.mrf.mxu0  ;;  %v4273_v38 = vpop.f32.mrf.mxu1 }
 0xa7e   : > { %v2687_v39 = vsel %vm1131_vm2, %v2679_v35, 0  ;;  %v2675_v49 = vpack.c.bf16 %v2221_v42, %v2221_v42 }
 0xa7f   : > { %v2062_v40 = vpop.f32.mrf.mxu0  ;;  %v2291_v41 = vpop.f32.mrf.mxu1  ;;  %4332 = vmatpush3.bf16.xpose.msra.mxu1 %v2687_v39 }
 0xa80   : > { %4343 = vmatprep.subr.bf16.mxu1 %v4654_v9 }
 0xa81   : > { %v4242_v44 = vpop.f32.mrf.mxu0  ;;  %v4274_v45 = vpop.f32.mrf.mxu1 }
 0xa83   : > { %v2111_v46 = vpop.f32.mrf.mxu0  ;;  %v2392_v47 = vpop.f32.mrf.mxu1 }
 0xa84   : > { %v2681_v50 = vpack.c.bf16 %v2392_v47, %v2392_v47  ;;  %v2222_v25 = vmul.f32 0.35355338, %v2111_v46 }
 0xa85   : > { %v4249_v51 = vpop.f32.mrf.mxu0  ;;  %v4289_v52 = vpop.f32.mrf.mxu1 }
 0xa86   : > { %v2779_v55 = vsel %vm1131_vm2, %v2681_v50, 0  ;;  %4334 = vmatmul.mubr.msk.bf16.vlgmr.msra.gmra.mxu1 %vm1131_vm2, %v2675_v49  ;;  %v2676_v28 = vpack.c.bf16 %v2222_v25, %v2222_v25 }
 0xa87   : > { %v2114_v56 = vpop.f32.mrf.mxu0  ;;  %v2395_v57 = vpop.f32.mrf.mxu1  ;;  %4344 = vmatpush3.bf16.xpose.msra.mxu1 %v2779_v55  ;;  %4345 = vmatprep.mubr.msk.bf16.mxu1 %vm4655_vm1, %v4654_v9 }
 0xa88   : > { %4355 = vmatprep.subr.bf16.mxu1 %v4654_v9 }
 0xa89   : > { %v4250_v58 = vpop.f32.mrf.mxu0  ;;  %v4290_v18 = vpop.f32.mrf.mxu1 }
 0xa8b   : > { %v2163_v60 = vpop.f32.mrf.mxu0  ;;  %v2513_v36 = vpop.f32.mrf.mxu1 }
 0xa8c   : > { %v2223_v61 = vmul.f32 0.35355338, %v2163_v60  ;;  %v2919_v62 = vpack.c.bf16 %v2513_v36, %v2513_v36 }
 0xa8d   : > { %v4257_v63 = vpop.f32.mrf.mxu0  ;;  %v4305_v1 = vpop.f32.mrf.mxu1 }
 0xa8e   : > { %v2677_v3 = vpack.c.bf16 %v2223_v61, %v2223_v61  ;;  %v2927_v4 = vsel %vm1377_vm3, %v2919_v62, 0 }
 0xa8f   : > { %v2166_v54 = vpop.f32.mrf.mxu0  ;;  %v2516_v15 = vpop.f32.mrf.mxu1 }
 0xa90   : > { %4346 = vmatmul.mubr.msk.bf16.vlgmr.msra.gmra.mxu1 %vm1131_vm2, %v2677_v3 }
 0xa91   : > { %4356 = vmatpush3.bf16.msra.mxu1 %v2927_v4  ;;  %v4258_v5 = vpop.f32.mrf.mxu0  ;;  %v4306_v6 = vpop.f32.mrf.mxu1  ;;  %4357 = vmatprep.mubr.msk.bf16.mxu1 %vm4655_vm1, %v4654_v9 }
 0xa92   : > { %4367 = vmatprep.subr.bf16.mxu1 %v4654_v9 }
 0xa93   : > { %v2215_v0 = vpop.f32.mrf.mxu0  ;;  %v5302_v7 = vpop.f32.mrf.mxu1 }
 0xa94   : > { %v2224_v33 = vmul.f32 0.35355338, %v2215_v0 }
 0xa95   : > { %v4265_v8 = vpop.f32.mrf.mxu0  ;;  %v4321_v17 = vpop.f32.mrf.mxu1 }
 0xa96   : > { %v2678_v37 = vpack.c.bf16 %v2224_v33, %v2224_v33 }
 0xa97   : > { %v2218_v19 = vpop.f32.mrf.mxu0  ;;  %v2620_v10 = vpop.f32.mrf.mxu1 }
 0xa99   : > { %v4266_v11 = vpop.f32.mrf.mxu0  ;;  %v4322_v12 = vpop.f32.mrf.mxu1 }
 0xa9b   : > { %v2340_v13 = vpop.f32.mrf.mxu0 }
 0xa9c   : > { %v2680_v14 = vpack.c.bf16 %v2340_v13, %v2340_v13 }
 0xa9d   : > { %v4281_v20 = vpop.f32.mrf.mxu0 }
 0xa9e   : > { %v2733_v21 = vsel %vm1131_vm2, %v2680_v14, 0 }
 0xa9f   : > { %v2343_v22 = vpop.f32.mrf.mxu0  ;;  %4338 = vmatpush3.bf16.xpose.msra.mxu0 %v2733_v21 }
 0xaa0   : > { %4349 = vmatprep.subr.bf16.mxu0 %v4654_v9 }
 0xaa1   : > { %v4282_v26 = vpop.f32.mrf.mxu0 }
 0xaa3   : > { %v2444_v27 = vpop.f32.mrf.mxu0 }
 0xaa4   : > { %v2682_v29 = vpack.c.bf16 %v2444_v27, %v2444_v27 }
 0xaa5   : > { %v4297_v30 = vpop.f32.mrf.mxu0 }
 0xaa6   : > { %v2825_v31 = vsel %vm1131_vm2, %v2682_v29, 0  ;;  %4340 = vmatmul.mubr.msk.bf16.vlgmr.msra.gmra.mxu0 %vm1131_vm2, %v2676_v28 }
 0xaa7   : > { %v2447_v32 = vpop.f32.mrf.mxu0  ;;  %4350 = vmatpush3.bf16.xpose.msra.mxu0 %v2825_v31  ;;  %4351 = vmatprep.mubr.msk.bf16.mxu0 %vm4655_vm1, %v4654_v9 }
 0xaa8   : > { %4361 = vmatprep.subr.bf16.mxu0 %v4654_v9 }
 0xaa9   : > { %v4298_v34 = vpop.f32.mrf.mxu0 }
 0xaab   : > { %v2565_v35 = vpop.f32.mrf.mxu0 }
 0xaac   : > { %v2920_v38 = vpack.c.bf16 %v2565_v35, %v2565_v35 }
 0xaad   : > { %v4313_v39 = vpop.f32.mrf.mxu0 }
 0xaae   : > { %v2973_v40 = vsel %vm1377_vm3, %v2920_v38, 0  ;;  %4352 = vmatmul.mubr.msk.bf16.vlgmr.msra.gmra.mxu0 %vm1131_vm2, %v2678_v37  ;;  %v2921_v39 = vpack.c.bf16 %v5302_v7, %v5302_v7 }
 0xaaf   : > { %v2568_v41 = vpop.f32.mrf.mxu0  ;;  %4362 = vmatpush3.bf16.msra.mxu0 %v2973_v40  ;;  %4363 = vmatprep.mubr.msk.bf16.mxu0 %vm4655_vm1, %v4654_v9 }
 0xab0   : > { %4373 = vmatprep.subr.bf16.mxu0 %v4654_v9 }
 0xab1   : > { %v4314_v42 = vpop.f32.mrf.mxu0 }
 0xab2   : > { %v3019_v42 = vsel %vm1377_vm3, %v2921_v39, 0 }
 0xab3   : > { %v5316_v44 = vpop.f32.mrf.mxu0 }
 0xab5   : > { %v4329_v45 = vpop.f32.mrf.mxu0 }
 0xab7   : > { %v2672_v46 = vpop.f32.mrf.mxu0 }
 0xab9   : > { %v4330_v47 = vpop.f32.mrf.mxu0 }
 0xb46   : > { %v2723_v49 = vpop.f32.mrf.mxu1 }
 0xb47   : > { %v2867_v50 = vsel %vm4979_vm4, %v2723_v49, -1e+30 }
 0xb48   : > { %v4335_v51 = vpop.f32.mrf.mxu1  ;;  %v2871_v52 = vsel %vm1131_vm2, %v2867_v50, -inf }
 0xb49   : > { %2872 = vmax.xlane.f32.xlu0 %v2871_v52  ;;  %v2922_v51 = vpack.c.bf16 %v5316_v44, %v5316_v44  ;;  %v3842_v44 = vld [vmem:[%s5519_s4 + $0x10] sm:$0xf] }
 0xb4a   : > { %v2726_v55 = vpop.f32.mrf.mxu1 }
 0xb4c   : > { %v4336_v56 = vpop.f32.mrf.mxu1 }
 0xb4d   : > { %v3065_v56 = vsel %vm1377_vm3, %v2922_v51, 0  ;;  %v3311_v51 = vrot.slane %v5152_v2, %v1761_v53  ;;  %v4539_v53 = vld [vmem:[%s5520_s5 + $0x10] sm:$0xff]  }
 0xb50   : > { %v2815_v57 = vpop.f32.mrf.mxu1 }
 0xb51   : > { %v2869_v58 = vsel %vm4979_vm4, %v2815_v57, -1e+30 }
 0xb52   : > { %v4347_v18 = vpop.f32.mrf.mxu1  ;;  %v2877_v60 = vsel %vm1131_vm2, %v2869_v58, -inf }
 0xb53   : > { %2878 = vmax.xlane.f32.xlu0 %v2877_v60  ;;  %v3120_v60 = vsel %vm1377_vm3, %v3842_v44, 0 }
 0xb54   : > { %v2818_v36 = vpop.f32.mrf.mxu1 }
 0xb55   : > { %v3843_v36 = vld [vmem:[%s5519_s4 + $0x14] sm:$0xf] }
 0xb56   : > { %v4348_v61 = vpop.f32.mrf.mxu1 }
 0xb57   : > { %v3166_v61 = vsel %vm1377_vm3, %v3843_v36, 0 }
 0xb66   : > { %v2769_v62 = vpop.f32.mrf.mxu0 }
 0xb67   : > { %v2868_v63 = vsel %vm4979_vm4, %v2769_v62, -1e+30  ;;  %v3844_v62 = vld [vmem:[%s5519_s4 + $0x18] sm:$0xf] }
 0xb68   : > { %v4341_v1 = vpop.f32.mrf.mxu0  ;;  %v2874_v3 = vsel %vm1131_vm2, %v2868_v63, -inf }
 0xb69   : > { %2875 = vmax.xlane.f32.xlu1 %v2874_v3  ;;  %v3212_v3 = vsel %vm1377_vm3, %v3844_v62, 0  ;;  %v4538_v62 = vld [vmem:[%s5520_s5 + $0x18] sm:$0xff]  }
 0xb6a   : > { %v2772_v4 = vpop.f32.mrf.mxu0 }
 0xb6c   : > { %v4342_v54 = vpop.f32.mrf.mxu0 }
 0xb6e   : > { %v2861_v15 = vpop.f32.mrf.mxu0 }
 0xb6f   : > { %v2870_v5 = vsel %vm4979_vm4, %v2861_v15, -1e+30 }
 0xb70   : > { %v4353_v6 = vpop.f32.mrf.mxu0  ;;  %v2880_v0 = vsel %vm1131_vm2, %v2870_v5, -inf }
 0xb71   : > { %2881 = vmax.xlane.f32.xlu1 %v2880_v0 }
 0xb72   : > { %v2864_v8 = vpop.f32.mrf.mxu0 }
 0xb74   : > { %v4354_v17 = vpop.f32.mrf.mxu0 }
 0xbd2   : > { %v2873_v19 = vpop.xlane.xlu0 %2872 }
 0xbd3   : > { %v2883_v10 = vsub.f32 %v2867_v50, %v2873_v19  ;;  %v3845_v19 = vld [vmem:[%s5519_s4 + $0x1c] sm:$0xf] }
 0xbd5   : > { %v2887_v11 = vmul.f32 1.442695, %v2883_v10 }
 0xbd7   : > { %4572 = vpow2.f32 %v2887_v11 }
 0xbdc   : > { %v2879_v12 = vpop.xlane.xlu0 %2878 }
 0xbdd   : > { %v2885_v13 = vsub.f32 %v2869_v58, %v2879_v12  ;;  %v3258_v12 = vsel %vm1377_vm3, %v3845_v19, 0  ;;  %v3334_v19 = vrot.slane %v5152_v2, %v1784_v24  ;;  %v3854_v24 = vld [vmem:[%s5523_s8 + $0x1] ss:$0 sm:$0xff] }
 0xbdf   : > { %v2891_v14 = vmul.f32 1.442695, %v2885_v13 }
 0xbe1   : > { %4574 = vpow2.f32 %v2891_v14 }
 0xbe4   : > { %v4573_v20 = vpop.eup %4572 }
 0xbe5   : > { %v2895_v21 = vsel %vm1131_vm2, %v4573_v20, 0.0 }
 0xbe6   : > { %2896 = vadd.xlane.f32.xlu0 %v2895_v21 }
 0xbee   : > { %v4575_v59 = vpop.eup %4574 }
 0xbef   : > { %v2901_v22 = vsel %vm1131_vm2, %v4575_v59, 0.0 }
 0xbf0   : > { %2902 = vadd.xlane.f32.xlu0 %v2901_v22 }
 0xbf2   : > { %v2876_v25 = vpop.xlane.xlu1 %2875 }
 0xbf3   : > { %v2884_v26 = vsub.f32 %v2868_v63, %v2876_v25 }
 0xbf5   : > { %v2889_v27 = vmul.f32 1.442695, %v2884_v26 }
 0xbf7   : > { %4576 = vpow2.f32 %v2889_v27 }
 0xbfa   : > { %v2882_v28 = vpop.xlane.xlu1 %2881 }
 0xbfb   : > { %v2886_v29 = vsub.f32 %v2870_v5, %v2882_v28 }
 0xbfd   : > { %v2893_v30 = vmul.f32 1.442695, %v2886_v29 }
 0xbff   : > { %4578 = vpow2.f32 %v2893_v30 }
 0xc04   : > { %v4577_v31 = vpop.eup %4576 }
 0xc05   : > { %v2898_v32 = vsel %vm1131_vm2, %v4577_v31, 0.0 }
 0xc06   : > { %2899 = vadd.xlane.f32.xlu1 %v2898_v32 }
 0xc0c   : > { %v4579_v33 = vpop.eup %4578 }
 0xc0d   : > { %v2904_v34 = vsel %vm1131_vm2, %v4579_v33, 0.0 }
 0xc0e   : > { %2905 = vadd.xlane.f32.xlu1 %v2904_v34 }
 0xc6f   : > { %v2897_v35 = vpop.xlane.xlu0 %2896 }
 0xc70   : > { %4580 = vrcp.f32 %v2897_v35 }
 0xc79   : > { %v2903_v37 = vpop.xlane.xlu0 %2902 }
 0xc7a   : > { %4582 = vrcp.f32 %v2903_v37 }
 0xc7d   : > { %v4581_v38 = vpop.eup %4580 }
 0xc7e   : > { %v2911_v40 = vmul.f32 %v4581_v38, %v4573_v20 }
 0xc80   : > { %v2915_v41 = vpack.c.bf16 %v2911_v40, %v2911_v40 }
 0xc82   : > { %4358 = vmatmul.mubr.msk.bf16.vlgmr.msra.gmra.mxu1 %vm1131_vm2, %v2915_v41 }
 0xc83   : > { %4368 = vmatpush3.bf16.msra.mxu1 %v3019_v42  ;;  %4369 = vmatprep.mubr.msk.bf16.mxu1 %vm4655_vm1, %v4654_v9 }
 0xc84   : > { %4379 = vmatprep.subr.bf16.mxu1 %v4654_v9 }
 0xc87   : > { %v4583_v45 = vpop.eup %4582 }
 0xc88   : > { %v2913_v46 = vmul.f32 %v4583_v45, %v4575_v59 }
 0xc8a   : > { %v2917_v47 = vpack.c.bf16 %v2913_v46, %v2913_v46 }
 0xc8c   : > { %4370 = vmatmul.mubr.msk.bf16.vlgmr.msra.gmra.mxu1 %vm1131_vm2, %v2917_v47 }
 0xc8d   : > { %4381 = vmatprep.mubr.msk.bf16.mxu1 %vm4655_vm1, %v4654_v9  ;;  %4380 = vmatpush3.bf16.msra.mxu1 %v3120_v60 }
 0xc8e   : > { %4391 = vmatprep.subr.bf16.mxu1 %v4654_v9 }
 0xc8f   : > { %v2900_v7 = vpop.xlane.xlu1 %2899 }
 0xc90   : > { %4584 = vrcp.f32 %v2900_v7 }
 0xc97   : > { %v2906_v49 = vpop.xlane.xlu1 %2905 }
 0xc98   : > { %4586 = vrcp.f32 %v2906_v49 }
 0xc9d   : > { %v4585_v50 = vpop.eup %4584 }
 0xc9e   : > { %v2912_v52 = vmul.f32 %v4585_v50, %v4577_v31 }
 0xca0   : > { %v2916_v55 = vpack.c.bf16 %v2912_v52, %v2912_v52 }
 0xca2   : > { %4364 = vmatmul.mubr.msk.bf16.vlgmr.msra.gmra.mxu0 %vm1131_vm2, %v2916_v55 }
 0xca3   : > { %4374 = vmatpush3.bf16.msra.mxu0 %v3065_v56  ;;  %4375 = vmatprep.mubr.msk.bf16.mxu0 %vm4655_vm1, %v4654_v9 }
 0xca4   : > { %4385 = vmatprep.subr.bf16.mxu0 %v4654_v9 }
 0xca5   : > { %v4587_v57 = vpop.eup %4586 }
 0xca6   : > { %v2914_v58 = vmul.f32 %v4587_v57, %v4579_v33 }
 0xca8   : > { %v2918_v18 = vpack.c.bf16 %v2914_v58, %v2914_v58 }
 0xcaa   : > { %4376 = vmatmul.mubr.msk.bf16.vlgmr.msra.gmra.mxu0 %vm1131_vm2, %v2918_v18 }
 0xcab   : > { %4387 = vmatprep.mubr.msk.bf16.mxu0 %vm4655_vm1, %v4654_v9  ;;  %4386 = vmatpush3.bf16.msra.mxu0 %v3166_v61 }
 0xcac   : > { %4397 = vmatprep.subr.bf16.mxu0 %v4654_v9 }
 0xd42   : > { %v2963_v63 = vpop.f32.mrf.mxu1 }
 0xd43   : > { %v3107_v1 = vpack.c.bf16 %v2963_v63, %v2963_v63  ;;  %v4541_v63 = vld [vmem:[%s5521_s6 + $0x70] sm:$0xff]  }
 0xd44   : > { %v4359_v4 = vpop.f32.mrf.mxu1 }
 0xd45   : > { %4382 = vmatmul.mubr.msk.bf16.vlgmr.msra.gmra.mxu1 %vm1131_vm2, %v3107_v1  ;;  %v4542_v1 = vld [vmem:[%s5521_s6 + $0x68] sm:$0xff]   ;;  %v4544_v4 = vld [vmem:[%s5521_s6 + $0x58] sm:$0xff]  }
 0xd46   : > { %v2966_v54 = vpop.f32.mrf.mxu1  ;;  %4392 = vmatpush3.bf16.msra.mxu1 %v3212_v3  ;;  %4393 = vmatprep.mubr.msk.bf16.mxu1 %vm4655_vm1, %v4654_v9  ;;  %v4543_v3 = vld [vmem:[%s5521_s6 + $0x60] sm:$0xff]  }
 0xd47   : > { %4403 = vmatprep.subr.bf16.mxu1 %v4654_v9  ;;  %v4545_v54 = vld [vmem:[%s5521_s6 + $0x50] sm:$0xff]  }
 0xd48   : > { %v4360_v15 = vpop.f32.mrf.mxu1 }
 0xd4c   : > { %v3055_v5 = vpop.f32.mrf.mxu1 }
 0xd4d   : > { %v3109_v6 = vpack.c.bf16 %v3055_v5, %v3055_v5 }
 0xd4e   : > { %v4371_v0 = vpop.f32.mrf.mxu1 }
 0xd4f   : > { %4394 = vmatmul.mubr.msk.bf16.vlgmr.msra.gmra.mxu1 %vm1131_vm2, %v3109_v6  ;;  %v3329_v0 = vrot.slane %v5152_v2, %v1779_v23  ;;  %v4547_v23 = vld [vmem:[%s5521_s6 + $0x40] sm:$0xff]  }
 0xd50   : > { %v3058_v8 = vpop.f32.mrf.mxu1  ;;  %4407 = vmatprep.mubr.msk.bf16.mxu1 %vm4655_vm1, %v4654_v9  ;;  %4404 = vmatpush3.bf16.msra.mxu1 %v4538_v62 }
 0xd51   : > { %4405 = vmatprep.subr.bf16.mxu1 %v4654_v9 }
 0xd52   : > { %v4372_v17 = vpop.f32.mrf.mxu1 }
 0xd54   : > { %4406 = vmatpush3.bf16.msra.mxu1 %v4539_v53 }
 0xd55   : > { %4431 = vmatprep.subr.bf16.mxu1 %v4654_v9 }
 0xd62   : > { %v3009_v10 = vpop.f32.mrf.mxu0 }
 0xd63   : > { %v3108_v11 = vpack.c.bf16 %v3009_v10, %v3009_v10 }
 0xd64   : > { %v4365_v13 = vpop.f32.mrf.mxu0 }
 0xd65   : > { %4388 = vmatmul.mubr.msk.bf16.vlgmr.msra.gmra.mxu0 %vm1131_vm2, %v3108_v11  ;;  %v4546_v13 = vld [vmem:[%s5521_s6 + $0x48] sm:$0xff]  }
 0xd66   : > { %v3012_v14 = vpop.f32.mrf.mxu0  ;;  %4398 = vmatpush3.bf16.msra.mxu0 %v3258_v12  ;;  %4399 = vmatprep.mubr.msk.bf16.mxu0 %vm4655_vm1, %v4654_v9 }
 0xd67   : > { %4411 = vmatprep.subr.bf16.mxu0 %v4654_v9 }
 0xd68   : > { %v4366_v20 = vpop.f32.mrf.mxu0 }
 0xd6a   : > { %v3101_v21 = vpop.f32.mrf.mxu0 }
 0xd6b   : > { %v3110_v59 = vpack.c.bf16 %v3101_v21, %v3101_v21 }
 0xd6c   : > { %v4377_v22 = vpop.f32.mrf.mxu0 }
 0xd6d   : > { %4400 = vmatmul.mubr.msk.bf16.vlgmr.msra.gmra.mxu0 %vm1131_vm2, %v3110_v59 }
 0xd6e   : > { %v3104_v25 = vpop.f32.mrf.mxu0  ;;  %4427 = vmatprep.mubr.msk.bf16.mxu0 %vm4655_vm1, %v4654_v9 }
 0xd70   : > { %v4378_v26 = vpop.f32.mrf.mxu0 }
 0xe05   : > { %v3156_v27 = vpop.f32.mrf.mxu1 }
 0xe06   : > { %v3300_v39 = vsel %vm418_vm0, %v3156_v27, 0.0  ;;  %v3514_v27 = vrot.slane %v5152_v2, %v1962_v43  ;;  %v4549_v43 = vld [vmem:[%s5525_s10] sm:$0xff]  }
 0xe07   : > { %v4383_v28 = vpop.f32.mrf.mxu1 }
 0xe09   : > { %v3159_v29 = vpop.f32.mrf.mxu1 }
 0xe0b   : > { %v4384_v30 = vpop.f32.mrf.mxu1 }
 0xe0f   : > { %v3248_v31 = vpop.f32.mrf.mxu1 }
 0xe10   : > { %v3303_v45 = vsel %vm418_vm0, %v3248_v31, 0.0 }
 0xe11   : > { %v4395_v32 = vpop.f32.mrf.mxu1 }
 0xe13   : > { %v3251_v33 = vpop.f32.mrf.mxu1 }
 0xe15   : > { %v4396_v34 = vpop.f32.mrf.mxu1 }
 0xe25   : > { %v3202_v35 = vpop.f32.mrf.mxu0 }
 0xe26   : > { %v3301_v37 = vsel %vm418_vm0, %v3202_v35, 0.0 }
 0xe27   : > { %v4389_v38 = vpop.f32.mrf.mxu0  ;;  %v3302_v40 = vadd.f32 %v3301_v37, %v3300_v39 }
 0xe29   : > { %v3205_v41 = vpop.f32.mrf.mxu0  ;;  %v3304_v47 = vadd.f32 %v3303_v45, %v3302_v40 }
 0xe2b   : > { %v4390_v42 = vpop.f32.mrf.mxu0 }
 0xe2d   : > { %v3294_v46 = vpop.f32.mrf.mxu0 }
 0xe2e   : > { %v3305_v7 = vsel %vm418_vm0, %v3294_v46, 0.0  ;;  %v3882_v46 = vld [vmem:[%s5524_s9] ss:$0 sm:$0xff] }
 0xe2f   : > { %v3306_v49 = vadd.f32 %v3305_v7, %v3304_v47  ;;  %v4401_v50 = vpop.f32.mrf.mxu0  ;;  %v3883_v7 = vld [vmem:[%s5524_s9 + $0x1] ss:$0 sm:$0xff] }
 0xe31   : > { %v3307_v52 = vadd.f32 %v3306_v49, %v5127_v48  ;;  %v3297_v55 = vpop.f32.mrf.mxu0  ;;  %v4540_v48 = vld [vmem:[%s5521_s6 + $0x78] sm:$0xff]  }
 0xe32   : > { %4412 = vmatpush3.bf16.msra.mxu0 %v4540_v48 }
 0xe33   : > { %v4402_v56 = vpop.f32.mrf.mxu0  ;;  %v3312_v57 = vadd.f32 %v3311_v51, %v3307_v52  ;;  %4413 = vmatprep.subr.bf16.mxu0 %v4654_v9 }
 0xe35   : > { %v3313_v58 = vsel %vm418_vm0, %v3312_v57, 0.0 }
 0xe36   : > { %3314 = vadd.xlane.f32.xlu0 %v3313_v58  ;;  %4414 = vmatpush3.bf16.msra.mxu0 %v4541_v63 }
 0xe37   : > { %4415 = vmatprep.subr.bf16.mxu0 %v4654_v9 }
 0xe3a   : > { %4416 = vmatpush3.bf16.msra.mxu0 %v4542_v1 }
 0xe3b   : > { %4417 = vmatprep.subr.bf16.mxu0 %v4654_v9 }
 0xe3e   : > { %4418 = vmatpush3.bf16.msra.mxu0 %v4543_v3 }
 0xe3f   : > { %4419 = vmatprep.subr.bf16.mxu0 %v4654_v9 }
 0xe42   : > { %4420 = vmatpush3.bf16.msra.mxu0 %v4544_v4 }
 0xe43   : > { %4421 = vmatprep.subr.bf16.mxu0 %v4654_v9 }
 0xe46   : > { %4422 = vmatpush3.bf16.msra.mxu0 %v4545_v54 }
 0xe47   : > { %4423 = vmatprep.subr.bf16.mxu0 %v4654_v9 }
 0xe4a   : > { %4424 = vmatpush3.bf16.msra.mxu0 %v4546_v13 }
 0xe4b   : > { %4425 = vmatprep.subr.bf16.mxu0 %v4654_v9 }
 0xe4e   : > { %4426 = vmatpush3.bf16.msra.mxu0 %v4547_v23 }
 0xebf   : > { %v3315_v18 = vpop.xlane.xlu0 %3314 }
 0xec0   : > { %v3316_v44 = vmul.f32 0.03125, %v3315_v18 }
 0xec2   : > { %v3317_v60 = vsub.f32 %v3312_v57, %v3316_v44 }
 0xec4   : > { %v3318_v36 = vmul.f32 %v3317_v60, %v3317_v60 }
 0xec6   : > { %v3319_v61 = vsel %vm418_vm0, %v3318_v36, 0.0 }
 0xec7   : > { %3320 = vadd.xlane.f32.xlu1 %v3319_v61 }
 0xf50   : > { %v3321_v15 = vpop.xlane.xlu1 %3320 }
 0xf51   : > { %v3322_v5 = vmul.f32 0.03125, %v3321_v15 }
 0xf53   : > { %v3323_v6 = vadd.f32 1e-05, %v3322_v5 }
 0xf55   : > { %4588 = vrsqrt.f32 %v3323_v6 }
 0xf62   : > { %v4589_v8 = vpop.eup %4588 }
 0xf63   : > { %v3325_v17 = vmul.f32 %v4589_v8, %v3317_v60 }
 0xf65   : > { %v3330_v10 = vmul.f32 %v3329_v0, %v3325_v17 }
 0xf67   : > { %v3335_v11 = vadd.f32 %v3334_v19, %v3330_v10 }
 0xf69   : > { %v3336_v12 = vpack.c.bf16 %v3335_v11, %v3335_v11 }
 0xf6b   : > { %4408 = vmatmul.mubr.msk.bf16.vlgmr.msra.gmra.mxu1 %vm418_vm0, %v3336_v12 }
 0xf6c   : > { %4435 = vmatprep.mubr.msk.bf16.mxu1 %vm4655_vm1, %v4654_v9  ;;  %4432 = vmatpush3.bf16.msra.mxu1 %v4548_v16 }
 0xf6d   : > { %4433 = vmatprep.subr.bf16.mxu1 %v4654_v9  ;;  %v3884_v9 = vld [vmem:[%s5526_s11] ss:$0 sm:$0xff] }
 0xf70   : > { %4434 = vmatpush3.bf16.msra.mxu1 %v4549_v43 }
0x102b   : > { %v3397_v14 = vpop.f32.mrf.mxu1 }
0x102c   : > { %v3398_v20 = vadd.f32 %v3854_v24, %v3397_v14 }
0x102d   : > { %v4409_v21 = vpop.f32.mrf.mxu1 }
0x102e   : > { %v3403_v59 = vmax.f32 %v3398_v20, 0.0 }
0x102f   : > { %v3400_v22 = vpop.f32.mrf.mxu1 }
0x1030   : > { %v3404_v25 = vpack.c.bf16 %v3403_v59, %v3403_v59 }
0x1031   : > { %v4410_v26 = vpop.f32.mrf.mxu1 }
0x1032   : > { %4428 = vmatmul.mubr.bf16.vlgmr.msra.gmra.mxu0 %v3404_v25 }
0x10f2   : > { %v3504_v28 = vpop.f32.mrf.mxu0 }
0x10f3   : > { %v3510_v29 = vadd.f32 %v3504_v28, %v3312_v57 }
0x10f4   : > { %v4429_v30 = vpop.f32.mrf.mxu0 }
0x10f5   : > { %v3515_v31 = vadd.f32 %v3514_v27, %v3510_v29 }
0x10f6   : > { %v3507_v32 = vpop.f32.mrf.mxu0 }
0x10f7   : > { %v3518_v33 = vsel %vm418_vm0, %v3515_v31, 0.0 }
0x10f8   : > { %3519 = vadd.xlane.f32.xlu0 %v3518_v33  ;;  %v4430_v34 = vpop.f32.mrf.mxu0 }
0x1181   : > { %v3520_v35 = vpop.xlane.xlu0 %3519 }
0x1182   : > { %v3521_v37 = vmul.f32 0.03125, %v3520_v35 }
0x1184   : > { %v3522_v38 = vsub.f32 %v3515_v31, %v3521_v37 }
0x1186   : > { %v3523_v39 = vmul.f32 %v3522_v38, %v3522_v38 }
0x1188   : > { %v3524_v40 = vsel %vm418_vm0, %v3523_v39, 0.0 }
0x1189   : > { %3525 = vadd.xlane.f32.xlu1 %v3524_v40 }
0x1212   : > { %v3526_v2 = vpop.xlane.xlu1 %3525 }
0x1213   : > { %v3527_v41 = vmul.f32 0.03125, %v3526_v2 }
0x1215   : > { %v3528_v42 = vadd.f32 1e-05, %v3527_v41 }
0x1217   : > { %4590 = vrsqrt.f32 %v3528_v42 }
0x1224   : > { %v4591_v45 = vpop.eup %4590 }
0x1225   : > { %v3530_v47 = vmul.f32 %v4591_v45, %v3522_v38 }
0x1227   : > { %v3535_v49 = vmul.f32 %v3882_v46, %v3530_v47 }
0x1229   : > { %v3540_v50 = vadd.f32 %v3883_v7, %v3535_v49 }
0x122b   : > { %v3541_v51 = vpack.c.bf16 %v3540_v50, %v3540_v50 }
0x122d   : > { %4436 = vmatmul.mubr.msk.bf16.vlgmr.msra.gmra.mxu1 %vm418_vm0, %v3541_v51 }
0x12ed   : > { %v3602_v52 = vpop.f32.mrf.mxu1 }
0x12ee   : > { %v3603_v55 = vadd.f32 %v3884_v9, %v3602_v52 }
0x12ef   : > { %v4437_v56 = vpop.f32.mrf.mxu1 }
0x12f0   : > { %3608 = vst [vmem:[%s404_s28] sm:$0xff] %v3603_v55 }
0x12f1   : > { %v3605_v57 = vpop.f32.mrf.mxu1 }
0x12f2   : > { %4605 = shalt.err (!%p4602_p3)
}
0x12f3   : > { %s4606_s26 = scalar_lea.hbm %s5474_s16, 128  ;;  %s4610_s15 = scalar_lea.hbm %s5527_s12, 256 }
0x12f4   : > { %p4607_p4 = scmp.ne.s32.totalorder %s5474_s16, %s4606_s26  ;;  %p4611_p9 = scmp.lt.s32.totalorder %s5474_s16, %s5527_s12 }
0x12f5   : > { %p4612_p10 = scmp.lt.s32.totalorder %s4610_s15, %s4606_s26 }
0x12f6   : > { %p4608_p7 = pnand %p4607_p4, %p4760_p5 }
0x12f7   : > { %p4613_p11 = por %p4612_p10, %p4611_p9 }
0x12f8   : > { %p4609_p8 = pneg %p4608_p7 }
0x12fa   : > { %p4614_p12 = pnand %p4613_p11, %p4609_p8 }
0x12fc   : > { %4617 = shalt.err (!%p4614_p12)
}
0x12fd   : > { %4439 = dma.vmem_to_hbm [thread:$0]  (%p4760_p5), %s5476_s29, 128, %s5474_s16, %s3610_s19   ;;  %v4438_v58 = vpop.f32.mrf.mxu1 }
0x12fe PF: > { %p4445_p13 = scmp.ge.s32.totalorder %s4652_s24, 2  ;;  %s3635_s20 = sand.u32 1, %s4640_s21  }
0x12ff   : > { %s3636_s1 = scalar_lea.sflag [#allocation3], %s3635_s20 }
0x1300   : > { %p4442_p0 = pnand %p4445_p13, %p4764_p6 }
0x1302   : > { %p4443_p1 = pneg %p4442_p0 }
0x1304   : > { %4635 = dma.done.wait (%p4443_p1), %s3636_s1, 128  }
0x1305   : > { %4637 = vsyncadd (%p4443_p1), %s3636_s1, 4294967168  ;;  %p22_p2 = scmp.ge.s32.totalorder %s4747_s27, 4   ;;  %s5536_s21 = smov %s4644_s22 }
0x1306   : > { %s5537_s22 = smov %s4648_s23  ;;  %s5538_s23 = smov %s4758_s30 }
0x1307   : > { %s5539_s24 = smov %s4747_s27  ;;  %24 = sbr.rel (!%p22_p2) target bundleno = 6 (0x6), region = 111 }
0x130c   :  { %3641 = vsyncpa [#allocation3], 1 }
0x130d   :  { %3643 = vsyncpa [#allocation3 + $0x1], 1 }

</bundles_post_ra>
